<compile_context>
chip_gen: v7x
topology: tpu7x:2x2x1
jax: 0.10.0
libtpu: 0.0.40
codegen_flags: <defaults>
</compile_context>

<pallas_src>
import functools

import numpy as np

import jax
import jax.numpy as jnp
from jax.experimental import pallas as pl
from jax.experimental.pallas import tpu as pltpu


_LANES = 128


# ----------------------------------------------------------------------------
# Fused kernel: conv1(+LeakyReLU+BN) -> conv4 -> maxpool(2,1) -> conv5
# ----------------------------------------------------------------------------
def _fused_combined_net_kernel(x_ref, w_ref, b_ref, o_ref, pad_ref, *, eps):
    """Whole forward pass in one kernel; all intermediates stay in VMEM.

    Lane-dense layout: lane j of every row holds pixel (w = j // C, c = j % C);
    lanes >= W*C are zero.

    x_ref  : (N, H, 128)     lane-dense input slab
    w_ref  : (11, 128, 128)  [0:3]=conv1, [3:6]=conv4, [6:9]=conv5 banded conv
                             matrices (kw taps + W-direction zero pad folded in),
                             [9]=BN per-channel mean matrix (incl. 1/(N*H*W)),
                             [10]=shift-left-by-C lane permutation (maxpool)
    b_ref  : (3, 128)        [0]=conv4 bias, [1]=conv5 bias, [2]=pool keep mask
    o_ref  : (N, H, 128)     lane-dense output slab (cropped in the wrapper)
    pad_ref: (N, H+2, 128)   VMEM scratch: H-direction zero-padded activations
    """
    N, H, L = x_ref.shape
    Ho = H - 1
    dn = (((1,), (0,)), ((), ()))
    zero_row = jnp.zeros((1, L), jnp.float32)

    def conv3x3(n, base):
        # 3x3 "same" conv = sum over kh of a row-shifted slab times a banded
        # (128, 128) weight matrix -> three small MXU matmuls, no im2col.
        acc = jax.lax.dot_general(pad_ref[n, 0:H, :], w_ref[base], dn,
                                  preferred_element_type=jnp.float32)
        for kh in (1, 2):
            acc = acc + jax.lax.dot_general(pad_ref[n, kh:kh + H, :],
                                            w_ref[base + kh], dn,
                                            preferred_element_type=jnp.float32)
        return acc                                               # (H, 128)

    # ---- stage 0: padded input slab (full-width interior write, only the two
    #      H-border rows need zeroing; W-direction pad lives in the band matrices)
    for n in range(N):
        pad_ref[n, 0:1, :] = zero_row
        pad_ref[n, H + 1:H + 2, :] = zero_row
        pad_ref[n, 1:H + 1, :] = x_ref[n]

    # ---- stage 1: conv1 (no bias) -> LeakyReLU(0.1); one-pass BN batch stats.
    #      w_ref[9] folds the per-channel gather, lane broadcast and 1/(N*H*W).
    h_all = []
    mean = jnp.zeros((1, L), jnp.float32)
    msq = jnp.zeros((1, L), jnp.float32)
    for n in range(N):
        h = conv3x3(n, 0)
        h = jnp.where(h > 0, h, 0.1 * h)                         # LeakyReLU(0.1)
        h_all.append(h)
        mean = mean + jnp.sum(
            jax.lax.dot_general(h, w_ref[9], dn,
                                preferred_element_type=jnp.float32),
            axis=0, keepdims=True)
        msq = msq + jnp.sum(
            jax.lax.dot_general(h * h, w_ref[9], dn,
                                preferred_element_type=jnp.float32),
            axis=0, keepdims=True)
    inv_std = jax.lax.rsqrt(msq - mean * mean + eps)             # biased batch var

    # ---- per image: BN normalize -> conv4+bias -> maxpool(2,1) -> conv5+bias
    for n in range(N):
        # stage 2 input: overwrite pad interior (borders stay zero -> no re-zero)
        pad_ref[n, 1:H + 1, :] = (h_all[n] - mean) * inv_std
        o4 = conv3x3(n, 3) + b_ref[0:1, :]
        # MaxPool2d(k=2, s=1): row-pair max, then lane shift by C via a 0/1
        # permutation matmul (MXU is idle; avoids any cross-lane shuffle).
        rmax = jnp.maximum(o4[0:Ho, :], o4[1:H, :])              # (Ho, 128)
        cshift = jax.lax.dot_general(rmax, w_ref[10], dn,
                                     preferred_element_type=jnp.float32)
        pooled = jnp.maximum(rmax, cshift) * b_ref[2:3, :]       # mask lanes >= Wo*C
        # stage 4 input: rows 1..Ho hold the pooled image; only the one stale
        # row (Ho+1) must be re-zeroed, the rest of the border is still zero.
        pad_ref[n, 1:Ho + 1, :] = pooled
        pad_ref[n, Ho + 1:Ho + 2, :] = zero_row
        # stage 4: conv5 + bias; full tile-aligned store, crop happens outside.
        o_ref[n, :, :] = conv3x3(n, 6) + b_ref[1:2, :]


# ----------------------------------------------------------------------------
# pallas_call wrapper
# ----------------------------------------------------------------------------
def _combined_net_pallas(x_slab, w_all, b_all, *, eps=1e-5):
    N, H, L = x_slab.shape
    nw = int(w_all.shape[0])
    nb = int(b_all.shape[0])
    kern = functools.partial(_fused_combined_net_kernel, eps=eps)

    # 12 (H,128)@(128,128) matmuls per image (3+3+3 convs, 1 shift, 2 BN stats).
    flops = N * 12 * 2 * H * L * L
    bytes_accessed = 4 * (x_slab.size + w_all.size + b_all.size + N * H * L)

    return pl.pallas_call(
        kern,
        out_shape=jax.ShapeDtypeStruct((N, H, L), jnp.float32),
        grid=(1,),
        in_specs=[
            pl.BlockSpec((N, H, L), lambda i: (0, 0, 0)),     # x slab
            pl.BlockSpec((nw, L, L), lambda i: (0, 0, 0)),    # packed matrices
            pl.BlockSpec((nb, L), lambda i: (0, 0)),          # biases + pool mask
        ],
        out_specs=pl.BlockSpec((N, H, L), lambda i: (0, 0, 0)),
        scratch_shapes=[pltpu.VMEM((N, H + 2, L), jnp.float32)],
        compiler_params=pltpu.CompilerParams(
            dimension_semantics=("arbitrary",)),
        cost_estimate=pl.CostEstimate(flops=flops, transcendentals=L,
                                      bytes_accessed=bytes_accessed),
    )(x_slab, w_all, b_all)


# ----------------------------------------------------------------------------
# Parameter init (raw PyTorch-style weights) + host-side packing for the kernel
# ----------------------------------------------------------------------------
def init_params(key, in_channels, out_channels):
    """Deterministic synthetic weights (shapes match the nn.Module __init__)."""
    assert in_channels == out_channels, "Architecture.forward requires Cin == Cout"
    ks = jax.random.split(key, 5)

    def conv_w(k):
        # PyTorch Conv2d weight is (Cout, Cin, 3, 3); keep an HWIO copy.
        w_oihw = jax.random.normal(k, (out_channels, in_channels, 3, 3),
                                   jnp.float32) * 0.1
        return jnp.transpose(w_oihw, (2, 3, 1, 0))            # (3, 3, Cin, Cout)

    def bias(k):
        return jax.random.normal(k, (out_channels,), jnp.float32) * 0.05

    return {
        "conv1_w": conv_w(ks[0]),                             # oneNode.conv, bias=False
        "conv4_w": conv_w(ks[1]), "conv4_b": bias(ks[2]),
        "conv5_w": conv_w(ks[3]), "conv5_b": bias(ks[4]),
    }


def pack_params_for_kernel(raw, N, H, W, lanes=_LANES):
    """Fold conv weights into lane-dense banded matrices + pack biases/masks."""
    C = int(raw["conv1_w"].shape[2])
    WC = W * C
    assert WC <= lanes, "lane-dense layout needs W*C <= 128"

    # S[kw, w_in, w_out] = 1 iff w_in == w_out + kw - 1 (valid taps only ->
    # W-direction zero padding is implicit in the band structure).
    S = np.zeros((3, W, W), np.float32)
    for kw in range(3):
        for wo in range(W):
            wi = wo + kw - 1
            if 0 <= wi < W:
                S[kw, wi, wo] = 1.0

    def bands(w_hwio):
        w = np.asarray(w_hwio, np.float32)                    # (3, 3, Cin, Cout)
        out = np.zeros((3, lanes, lanes), np.float32)
        for kh in range(3):
            b4 = np.einsum("kwv,kio->wivo", S, w[kh])         # (W, C, W, C)
            out[kh, :WC, :WC] = b4.reshape(WC, WC)
        return out

    def bias_lane(b):
        v = np.zeros((lanes,), np.float32)
        v[:WC] = np.tile(np.asarray(b, np.float32), W)
        return v

    # BN matrix: per-channel gather + broadcast to every lane + 1/(N*H*W) scale.
    ii = np.arange(lanes)[:, None]
    jj = np.arange(lanes)[None, :]
    r_mat = (((ii % C) == (jj % C)) & (ii < WC)).astype(np.float32) / float(N * H * W)

    # MaxPool lane-shift permutation: (x @ P)[:, j] = x[:, j + C] (zero fill).
    p_shift = np.zeros((lanes, lanes), np.float32)
    p_shift[np.arange(C, lanes), np.arange(lanes - C)] = 1.0

    w_all = np.concatenate([bands(raw["conv1_w"]),
                            bands(raw["conv4_w"]),
                            bands(raw["conv5_w"]),
                            r_mat[None], p_shift[None]], axis=0)   # (11, 128, 128)

    keep = (np.arange(lanes) < (W - 1) * C).astype(np.float32)      # pool mask
    b_all = np.stack([bias_lane(raw["conv4_b"]),
                      bias_lane(raw["conv5_b"]), keep])             # (3, 128)

    return {"w_all": jnp.asarray(w_all), "b_all": jnp.asarray(b_all)}


@jax.jit
def combined_net_forward(x_nchw, kernel_params):
    """x_nchw: (N, C, H, W) float32 (PyTorch layout). Returns (N, C, H-1, W-1)."""
    N, C, H, W = x_nchw.shape
    Ho, Wo = H - 1, W - 1
    # Lane-dense layout plumbing (pure XLA, fuses with the transposes).
    x = jnp.transpose(x_nchw, (0, 2, 3, 1)).reshape(N, H, W * C)
    x = jnp.pad(x, ((0, 0), (0, 0), (0, _LANES - W * C)))
    y = _combined_net_pallas(x, kernel_params["w_all"], kernel_params["b_all"])
    # Tile-aligned kernel store; the crop only touches a few KB here in XLA.
    y = y[:, :Ho, :Wo * C].reshape(N, Ho, Wo, C)
    return jnp.transpose(y, (0, 3, 1, 2))                          # -> NCHW


# ----------------------------------------------------------------------------
# Pure-JAX reference (for correctness assertion)
# ----------------------------------------------------------------------------
def _reference_forward(x_nchw, raw, eps=1e-5):
    x = jnp.transpose(x_nchw, (0, 2, 3, 1)).astype(jnp.float32)

    def conv(x_in, w_hwio, b=None):
        n, h, w_, c = x_in.shape
        xp = jnp.pad(x_in, ((0, 0), (1, 1), (1, 1), (0, 0)))
        out = jnp.zeros((n, h, w_, w_hwio.shape[-1]), jnp.float32)
        for kh in range(3):
            for kw in range(3):
                out = out + jnp.einsum("nhwc,cd->nhwd",
                                       xp[:, kh:kh + h, kw:kw + w_, :],
                                       w_hwio[kh, kw])
            if False:
                pass
        if b is not None:
            out = out + b.reshape(1, 1, 1, -1)
        return out

    h1 = conv(x, raw["conv1_w"])
    h1 = jnp.where(h1 > 0, h1, 0.1 * h1)
    mean = jnp.mean(h1, axis=(0, 1, 2), keepdims=True)
    var = jnp.mean((h1 - mean) ** 2, axis=(0, 1, 2), keepdims=True)
    h1 = (h1 - mean) * jax.lax.rsqrt(var + eps)
    o = conv(h1, raw["conv4_w"], raw["conv4_b"])
    o = jnp.maximum(jnp.maximum(o[:, :-1, :-1, :], o[:, :-1, 1:, :]),
                    jnp.maximum(o[:, 1:, :-1, :], o[:, 1:, 1:, :]))
    o = conv(o, raw["conv5_w"], raw["conv5_b"])
    return jnp.transpose(o, (0, 3, 1, 2))


if __name__ == "__main__":
    N, C, H, W = 2, 4, 16, 16          # in_channels == out_channels == 4
    num_classes = 10                   # unused by the forward pass
    key = jax.random.PRNGKey(0)
    k_x, k_p = jax.random.split(key)

    x = jax.random.normal(k_x, (N, C, H, W), jnp.float32)
    raw_params = init_params(k_p, C, C)
    kernel_params = pack_params_for_kernel(raw_params, N, H, W)

    out = combined_net_forward(x, kernel_params)
    out = jax.block_until_ready(out)
    assert out.shape == (N, C, H - 1, W - 1), out.shape
    assert bool(jnp.all(jnp.isfinite(out)))

    ref = _reference_forward(x, raw_params)
    assert bool(jnp.allclose(out, ref, rtol=2e-4, atol=2e-4)), \
        float(jnp.max(jnp.abs(out - ref)))

    print("KERNEL_OK")
</pallas_src>

<mosaic_0001>
module attributes {stable_mosaic.version = 11 : i64} {
  func.func @_fused_combined_net_kernel(%arg0: i32, %arg1: memref<2x16x128xf32, #tpu.memory_space<vmem>>, %arg2: memref<11x128x128xf32, #tpu.memory_space<vmem>>, %arg3: memref<3x128xf32, #tpu.memory_space<vmem>>, %arg4: memref<2x16x128xf32, #tpu.memory_space<vmem>>, %arg5: memref<2x18x128xf32, #tpu.memory_space<vmem>>) attributes {dimension_semantics = [#tpu.dimension_semantics<arbitrary>], iteration_bounds = array<i64: 1>, scalar_prefetch = 0 : i64, scratch_operands = 1 : i64, tpu.core_type = #tpu.core_type<tc>, window_params = [{pipeline_mode = #tpu.pipeline_mode<synchronous>, transform_indices = @transform_0, window_bounds = array<i64: 2, 16, 128>}, {pipeline_mode = #tpu.pipeline_mode<synchronous>, transform_indices = @transform_1, window_bounds = array<i64: 11, 128, 128>}, {pipeline_mode = #tpu.pipeline_mode<synchronous>, transform_indices = @transform_2, window_bounds = array<i64: 3, 128>}, {pipeline_mode = #tpu.pipeline_mode<synchronous>, transform_indices = @transform_3, window_bounds = array<i64: 2, 16, 128>}]} {
    %cst = arith.constant 0.000000e+00 : f32
    %0 = vector.broadcast %cst : f32 to vector<1x128xf32>
    %c0 = arith.constant 0 : index
    %c0_0 = arith.constant 0 : index
    %c0_1 = arith.constant 0 : index
    %1 = vector.load %arg5[%c0, %c0_0, %c0_1] : memref<2x18x128xf32, #tpu.memory_space<vmem>>, vector<1x1x128xf32>
    %2 = vector.shape_cast %1 : vector<1x1x128xf32> to vector<1x128xf32>
    %3 = vector.shape_cast %0 : vector<1x128xf32> to vector<1x1x128xf32>
    tpu.vector_store %arg5[%c0, %c0_0, %c0_1], %3 {strides = array<i32>} : memref<2x18x128xf32, #tpu.memory_space<vmem>>, vector<1x1x128xf32>,
    %c0_2 = arith.constant 0 : index
    %c17 = arith.constant 17 : index
    %c0_3 = arith.constant 0 : index
    %4 = vector.load %arg5[%c0_2, %c17, %c0_3] : memref<2x18x128xf32, #tpu.memory_space<vmem>>, vector<1x1x128xf32>
    %5 = vector.shape_cast %4 : vector<1x1x128xf32> to vector<1x128xf32>
    %6 = vector.shape_cast %0 : vector<1x128xf32> to vector<1x1x128xf32>
    tpu.vector_store %arg5[%c0_2, %c17, %c0_3], %6 {strides = array<i32>} : memref<2x18x128xf32, #tpu.memory_space<vmem>>, vector<1x1x128xf32>,
    %c0_4 = arith.constant 0 : index
    %c0_5 = arith.constant 0 : index
    %c0_6 = arith.constant 0 : index
    %7 = vector.load %arg1[%c0_4, %c0_5, %c0_6] : memref<2x16x128xf32, #tpu.memory_space<vmem>>, vector<1x16x128xf32>
    %8 = vector.shape_cast %7 : vector<1x16x128xf32> to vector<16x128xf32>
    %c0_7 = arith.constant 0 : index
    %c1 = arith.constant 1 : index
    %c0_8 = arith.constant 0 : index
    %9 = vector.load %arg5[%c0_7, %c1, %c0_8] : memref<2x18x128xf32, #tpu.memory_space<vmem>>, vector<1x16x128xf32>
    %10 = vector.shape_cast %9 : vector<1x16x128xf32> to vector<16x128xf32>
    %11 = vector.shape_cast %8 : vector<16x128xf32> to vector<1x16x128xf32>
    tpu.vector_store %arg5[%c0_7, %c1, %c0_8], %11 {strides = array<i32>} : memref<2x18x128xf32, #tpu.memory_space<vmem>>, vector<1x16x128xf32>,
    %c1_9 = arith.constant 1 : index
    %c0_10 = arith.constant 0 : index
    %c0_11 = arith.constant 0 : index
    %12 = vector.load %arg5[%c1_9, %c0_10, %c0_11] : memref<2x18x128xf32, #tpu.memory_space<vmem>>, vector<1x1x128xf32>
    %13 = vector.shape_cast %12 : vector<1x1x128xf32> to vector<1x128xf32>
    %14 = vector.shape_cast %0 : vector<1x128xf32> to vector<1x1x128xf32>
    tpu.vector_store %arg5[%c1_9, %c0_10, %c0_11], %14 {strides = array<i32>} : memref<2x18x128xf32, #tpu.memory_space<vmem>>, vector<1x1x128xf32>,
    %c1_12 = arith.constant 1 : index
    %c17_13 = arith.constant 17 : index
    %c0_14 = arith.constant 0 : index
    %15 = vector.load %arg5[%c1_12, %c17_13, %c0_14] : memref<2x18x128xf32, #tpu.memory_space<vmem>>, vector<1x1x128xf32>
    %16 = vector.shape_cast %15 : vector<1x1x128xf32> to vector<1x128xf32>
    %17 = vector.shape_cast %0 : vector<1x128xf32> to vector<1x1x128xf32>
    tpu.vector_store %arg5[%c1_12, %c17_13, %c0_14], %17 {strides = array<i32>} : memref<2x18x128xf32, #tpu.memory_space<vmem>>, vector<1x1x128xf32>,
    %c1_15 = arith.constant 1 : index
    %c0_16 = arith.constant 0 : index
    %c0_17 = arith.constant 0 : index
    %18 = vector.load %arg1[%c1_15, %c0_16, %c0_17] : memref<2x16x128xf32, #tpu.memory_space<vmem>>, vector<1x16x128xf32>
    %19 = vector.shape_cast %18 : vector<1x16x128xf32> to vector<16x128xf32>
    %c1_18 = arith.constant 1 : index
    %c1_19 = arith.constant 1 : index
    %c0_20 = arith.constant 0 : index
    %20 = vector.load %arg5[%c1_18, %c1_19, %c0_20] : memref<2x18x128xf32, #tpu.memory_space<vmem>>, vector<1x16x128xf32>
    %21 = vector.shape_cast %20 : vector<1x16x128xf32> to vector<16x128xf32>
    %22 = vector.shape_cast %19 : vector<16x128xf32> to vector<1x16x128xf32>
    tpu.vector_store %arg5[%c1_18, %c1_19, %c0_20], %22 {strides = array<i32>} : memref<2x18x128xf32, #tpu.memory_space<vmem>>, vector<1x16x128xf32>,
    %cst_21 = arith.constant 0.000000e+00 : f32
    %23 = vector.broadcast %cst_21 : f32 to vector<1x128xf32>
    %cst_22 = arith.constant 0.000000e+00 : f32
    %24 = vector.broadcast %cst_22 : f32 to vector<1x128xf32>
    %c0_23 = arith.constant 0 : index
    %c0_24 = arith.constant 0 : index
    %c0_25 = arith.constant 0 : index
    %25 = vector.load %arg5[%c0_23, %c0_24, %c0_25] : memref<2x18x128xf32, #tpu.memory_space<vmem>>, vector<1x16x128xf32>
    %26 = vector.shape_cast %25 : vector<1x16x128xf32> to vector<16x128xf32>
    %c0_26 = arith.constant 0 : index
    %c0_27 = arith.constant 0 : index
    %c0_28 = arith.constant 0 : index
    %27 = vector.load %arg2[%c0_26, %c0_27, %c0_28] : memref<11x128x128xf32, #tpu.memory_space<vmem>>, vector<1x128x128xf32>
    %28 = vector.shape_cast %27 : vector<1x128x128xf32> to vector<128x128xf32>
    %cst_29 = arith.constant dense<0.000000e+00> : vector<16x128xf32>
    %29 = tpu.matmul %26, %28, %cst_29 {dimension_numbers = #tpu.dot_dimension_numbers<[1], [0], [0], [1], [0, 0, 1, 1], [], []>} : vector<16x128xf32>, vector<128x128xf32>, vector<16x128xf32> -> vector<16x128xf32>
    %c0_30 = arith.constant 0 : index
    %c1_31 = arith.constant 1 : index
    %c0_32 = arith.constant 0 : index
    %30 = vector.load %arg5[%c0_30, %c1_31, %c0_32] : memref<2x18x128xf32, #tpu.memory_space<vmem>>, vector<1x16x128xf32>
    %31 = vector.shape_cast %30 : vector<1x16x128xf32> to vector<16x128xf32>
    %c1_33 = arith.constant 1 : index
    %c0_34 = arith.constant 0 : index
    %c0_35 = arith.constant 0 : index
    %32 = vector.load %arg2[%c1_33, %c0_34, %c0_35] : memref<11x128x128xf32, #tpu.memory_space<vmem>>, vector<1x128x128xf32>
    %33 = vector.shape_cast %32 : vector<1x128x128xf32> to vector<128x128xf32>
    %cst_36 = arith.constant dense<0.000000e+00> : vector<16x128xf32>
    %34 = tpu.matmul %31, %33, %cst_36 {dimension_numbers = #tpu.dot_dimension_numbers<[1], [0], [0], [1], [0, 0, 1, 1], [], []>} : vector<16x128xf32>, vector<128x128xf32>, vector<16x128xf32> -> vector<16x128xf32>
    %35 = arith.addf %29, %34 : vector<16x128xf32>
    %c0_37 = arith.constant 0 : index
    %c2 = arith.constant 2 : index
    %c0_38 = arith.constant 0 : index
    %36 = vector.load %arg5[%c0_37, %c2, %c0_38] : memref<2x18x128xf32, #tpu.memory_space<vmem>>, vector<1x16x128xf32>
    %37 = vector.shape_cast %36 : vector<1x16x128xf32> to vector<16x128xf32>
    %c2_39 = arith.constant 2 : index
    %c0_40 = arith.constant 0 : index
    %c0_41 = arith.constant 0 : index
    %38 = vector.load %arg2[%c2_39, %c0_40, %c0_41] : memref<11x128x128xf32, #tpu.memory_space<vmem>>, vector<1x128x128xf32>
    %39 = vector.shape_cast %38 : vector<1x128x128xf32> to vector<128x128xf32>
    %cst_42 = arith.constant dense<0.000000e+00> : vector<16x128xf32>
    %40 = tpu.matmul %37, %39, %cst_42 {dimension_numbers = #tpu.dot_dimension_numbers<[1], [0], [0], [1], [0, 0, 1, 1], [], []>} : vector<16x128xf32>, vector<128x128xf32>, vector<16x128xf32> -> vector<16x128xf32>
    %41 = arith.addf %35, %40 : vector<16x128xf32>
    %cst_43 = arith.constant 0.000000e+00 : f32
    %42 = vector.broadcast %cst_43 : f32 to vector<16x128xf32>
    %43 = arith.cmpf ogt, %41, %42 : vector<16x128xf32>
    %cst_44 = arith.constant 1.000000e-01 : f32
    %44 = vector.broadcast %cst_44 : f32 to vector<16x128xf32>
    %45 = arith.mulf %44, %41 : vector<16x128xf32>
    %46 = arith.select %43, %41, %45 : vector<16x128xi1>, vector<16x128xf32>
    %c9 = arith.constant 9 : index
    %c0_45 = arith.constant 0 : index
    %c0_46 = arith.constant 0 : index
    %47 = vector.load %arg2[%c9, %c0_45, %c0_46] : memref<11x128x128xf32, #tpu.memory_space<vmem>>, vector<1x128x128xf32>
    %48 = vector.shape_cast %47 : vector<1x128x128xf32> to vector<128x128xf32>
    %cst_47 = arith.constant dense<0.000000e+00> : vector<16x128xf32>
    %49 = tpu.matmul %46, %48, %cst_47 {dimension_numbers = #tpu.dot_dimension_numbers<[1], [0], [0], [1], [0, 0, 1, 1], [], []>} : vector<16x128xf32>, vector<128x128xf32>, vector<16x128xf32> -> vector<16x128xf32>
    %cst_48 = arith.constant dense<0.000000e+00> : vector<128xf32>
    %50 = vector.multi_reduction <add>, %49, %cst_48 [0] : vector<16x128xf32> to vector<128xf32>
    %51 = vector.shape_cast %50 : vector<128xf32> to vector<1x128xf32>
    %52 = arith.addf %23, %51 : vector<1x128xf32>
    %53 = arith.mulf %46, %46 : vector<16x128xf32>
    %c9_49 = arith.constant 9 : index
    %c0_50 = arith.constant 0 : index
    %c0_51 = arith.constant 0 : index
    %54 = vector.load %arg2[%c9_49, %c0_50, %c0_51] : memref<11x128x128xf32, #tpu.memory_space<vmem>>, vector<1x128x128xf32>
    %55 = vector.shape_cast %54 : vector<1x128x128xf32> to vector<128x128xf32>
    %cst_52 = arith.constant dense<0.000000e+00> : vector<16x128xf32>
    %56 = tpu.matmul %53, %55, %cst_52 {dimension_numbers = #tpu.dot_dimension_numbers<[1], [0], [0], [1], [0, 0, 1, 1], [], []>} : vector<16x128xf32>, vector<128x128xf32>, vector<16x128xf32> -> vector<16x128xf32>
    %cst_53 = arith.constant dense<0.000000e+00> : vector<128xf32>
    %57 = vector.multi_reduction <add>, %56, %cst_53 [0] : vector<16x128xf32> to vector<128xf32>
    %58 = vector.shape_cast %57 : vector<128xf32> to vector<1x128xf32>
    %59 = arith.addf %24, %58 : vector<1x128xf32>
    %c1_54 = arith.constant 1 : index
    %c0_55 = arith.constant 0 : index
    %c0_56 = arith.constant 0 : index
    %60 = vector.load %arg5[%c1_54, %c0_55, %c0_56] : memref<2x18x128xf32, #tpu.memory_space<vmem>>, vector<1x16x128xf32>
    %61 = vector.shape_cast %60 : vector<1x16x128xf32> to vector<16x128xf32>
    %c0_57 = arith.constant 0 : index
    %c0_58 = arith.constant 0 : index
    %c0_59 = arith.constant 0 : index
    %62 = vector.load %arg2[%c0_57, %c0_58, %c0_59] : memref<11x128x128xf32, #tpu.memory_space<vmem>>, vector<1x128x128xf32>
    %63 = vector.shape_cast %62 : vector<1x128x128xf32> to vector<128x128xf32>
    %cst_60 = arith.constant dense<0.000000e+00> : vector<16x128xf32>
    %64 = tpu.matmul %61, %63, %cst_60 {dimension_numbers = #tpu.dot_dimension_numbers<[1], [0], [0], [1], [0, 0, 1, 1], [], []>} : vector<16x128xf32>, vector<128x128xf32>, vector<16x128xf32> -> vector<16x128xf32>
    %c1_61 = arith.constant 1 : index
    %c1_62 = arith.constant 1 : index
    %c0_63 = arith.constant 0 : index
    %65 = vector.load %arg5[%c1_61, %c1_62, %c0_63] : memref<2x18x128xf32, #tpu.memory_space<vmem>>, vector<1x16x128xf32>
    %66 = vector.shape_cast %65 : vector<1x16x128xf32> to vector<16x128xf32>
    %c1_64 = arith.constant 1 : index
    %c0_65 = arith.constant 0 : index
    %c0_66 = arith.constant 0 : index
    %67 = vector.load %arg2[%c1_64, %c0_65, %c0_66] : memref<11x128x128xf32, #tpu.memory_space<vmem>>, vector<1x128x128xf32>
    %68 = vector.shape_cast %67 : vector<1x128x128xf32> to vector<128x128xf32>
    %cst_67 = arith.constant dense<0.000000e+00> : vector<16x128xf32>
    %69 = tpu.matmul %66, %68, %cst_67 {dimension_numbers = #tpu.dot_dimension_numbers<[1], [0], [0], [1], [0, 0, 1, 1], [], []>} : vector<16x128xf32>, vector<128x128xf32>, vector<16x128xf32> -> vector<16x128xf32>
    %70 = arith.addf %64, %69 : vector<16x128xf32>
    %c1_68 = arith.constant 1 : index
    %c2_69 = arith.constant 2 : index
    %c0_70 = arith.constant 0 : index
    %71 = vector.load %arg5[%c1_68, %c2_69, %c0_70] : memref<2x18x128xf32, #tpu.memory_space<vmem>>, vector<1x16x128xf32>
    %72 = vector.shape_cast %71 : vector<1x16x128xf32> to vector<16x128xf32>
    %c2_71 = arith.constant 2 : index
    %c0_72 = arith.constant 0 : index
    %c0_73 = arith.constant 0 : index
    %73 = vector.load %arg2[%c2_71, %c0_72, %c0_73] : memref<11x128x128xf32, #tpu.memory_space<vmem>>, vector<1x128x128xf32>
    %74 = vector.shape_cast %73 : vector<1x128x128xf32> to vector<128x128xf32>
    %cst_74 = arith.constant dense<0.000000e+00> : vector<16x128xf32>
    %75 = tpu.matmul %72, %74, %cst_74 {dimension_numbers = #tpu.dot_dimension_numbers<[1], [0], [0], [1], [0, 0, 1, 1], [], []>} : vector<16x128xf32>, vector<128x128xf32>, vector<16x128xf32> -> vector<16x128xf32>
    %76 = arith.addf %70, %75 : vector<16x128xf32>
    %cst_75 = arith.constant 0.000000e+00 : f32
    %77 = vector.broadcast %cst_75 : f32 to vector<16x128xf32>
    %78 = arith.cmpf ogt, %76, %77 : vector<16x128xf32>
    %cst_76 = arith.constant 1.000000e-01 : f32
    %79 = vector.broadcast %cst_76 : f32 to vector<16x128xf32>
    %80 = arith.mulf %79, %76 : vector<16x128xf32>
    %81 = arith.select %78, %76, %80 : vector<16x128xi1>, vector<16x128xf32>
    %c9_77 = arith.constant 9 : index
    %c0_78 = arith.constant 0 : index
    %c0_79 = arith.constant 0 : index
    %82 = vector.load %arg2[%c9_77, %c0_78, %c0_79] : memref<11x128x128xf32, #tpu.memory_space<vmem>>, vector<1x128x128xf32>
    %83 = vector.shape_cast %82 : vector<1x128x128xf32> to vector<128x128xf32>
    %cst_80 = arith.constant dense<0.000000e+00> : vector<16x128xf32>
    %84 = tpu.matmul %81, %83, %cst_80 {dimension_numbers = #tpu.dot_dimension_numbers<[1], [0], [0], [1], [0, 0, 1, 1], [], []>} : vector<16x128xf32>, vector<128x128xf32>, vector<16x128xf32> -> vector<16x128xf32>
    %cst_81 = arith.constant dense<0.000000e+00> : vector<128xf32>
    %85 = vector.multi_reduction <add>, %84, %cst_81 [0] : vector<16x128xf32> to vector<128xf32>
    %86 = vector.shape_cast %85 : vector<128xf32> to vector<1x128xf32>
    %87 = arith.addf %52, %86 : vector<1x128xf32>
    %88 = arith.mulf %81, %81 : vector<16x128xf32>
    %c9_82 = arith.constant 9 : index
    %c0_83 = arith.constant 0 : index
    %c0_84 = arith.constant 0 : index
    %89 = vector.load %arg2[%c9_82, %c0_83, %c0_84] : memref<11x128x128xf32, #tpu.memory_space<vmem>>, vector<1x128x128xf32>
    %90 = vector.shape_cast %89 : vector<1x128x128xf32> to vector<128x128xf32>
    %cst_85 = arith.constant dense<0.000000e+00> : vector<16x128xf32>
    %91 = tpu.matmul %88, %90, %cst_85 {dimension_numbers = #tpu.dot_dimension_numbers<[1], [0], [0], [1], [0, 0, 1, 1], [], []>} : vector<16x128xf32>, vector<128x128xf32>, vector<16x128xf32> -> vector<16x128xf32>
    %cst_86 = arith.constant dense<0.000000e+00> : vector<128xf32>
    %92 = vector.multi_reduction <add>, %91, %cst_86 [0] : vector<16x128xf32> to vector<128xf32>
    %93 = vector.shape_cast %92 : vector<128xf32> to vector<1x128xf32>
    %94 = arith.addf %59, %93 : vector<1x128xf32>
    %95 = arith.mulf %87, %87 : vector<1x128xf32>
    %96 = arith.subf %94, %95 : vector<1x128xf32>
    %cst_87 = arith.constant 9.99999974E-6 : f32
    %97 = vector.broadcast %cst_87 : f32 to vector<1x128xf32>
    %98 = arith.addf %96, %97 : vector<1x128xf32>
    %99 = math.rsqrt %98 : vector<1x128xf32>
    %100 = vector.broadcast %87 : vector<1x128xf32> to vector<16x128xf32>
    %101 = arith.subf %46, %100 : vector<16x128xf32>
    %102 = vector.broadcast %99 : vector<1x128xf32> to vector<16x128xf32>
    %103 = arith.mulf %101, %102 : vector<16x128xf32>
    %c0_88 = arith.constant 0 : index
    %c1_89 = arith.constant 1 : index
    %c0_90 = arith.constant 0 : index
    %104 = vector.load %arg5[%c0_88, %c1_89, %c0_90] : memref<2x18x128xf32, #tpu.memory_space<vmem>>, vector<1x16x128xf32>
    %105 = vector.shape_cast %104 : vector<1x16x128xf32> to vector<16x128xf32>
    %106 = vector.shape_cast %103 : vector<16x128xf32> to vector<1x16x128xf32>
    tpu.vector_store %arg5[%c0_88, %c1_89, %c0_90], %106 {strides = array<i32>} : memref<2x18x128xf32, #tpu.memory_space<vmem>>, vector<1x16x128xf32>,
    %c0_91 = arith.constant 0 : index
    %c0_92 = arith.constant 0 : index
    %c0_93 = arith.constant 0 : index
    %107 = vector.load %arg5[%c0_91, %c0_92, %c0_93] : memref<2x18x128xf32, #tpu.memory_space<vmem>>, vector<1x16x128xf32>
    %108 = vector.shape_cast %107 : vector<1x16x128xf32> to vector<16x128xf32>
    %c3 = arith.constant 3 : index
    %c0_94 = arith.constant 0 : index
    %c0_95 = arith.constant 0 : index
    %109 = vector.load %arg2[%c3, %c0_94, %c0_95] : memref<11x128x128xf32, #tpu.memory_space<vmem>>, vector<1x128x128xf32>
    %110 = vector.shape_cast %109 : vector<1x128x128xf32> to vector<128x128xf32>
    %cst_96 = arith.constant dense<0.000000e+00> : vector<16x128xf32>
    %111 = tpu.matmul %108, %110, %cst_96 {dimension_numbers = #tpu.dot_dimension_numbers<[1], [0], [0], [1], [0, 0, 1, 1], [], []>} : vector<16x128xf32>, vector<128x128xf32>, vector<16x128xf32> -> vector<16x128xf32>
    %c0_97 = arith.constant 0 : index
    %c1_98 = arith.constant 1 : index
    %c0_99 = arith.constant 0 : index
    %112 = vector.load %arg5[%c0_97, %c1_98, %c0_99] : memref<2x18x128xf32, #tpu.memory_space<vmem>>, vector<1x16x128xf32>
    %113 = vector.shape_cast %112 : vector<1x16x128xf32> to vector<16x128xf32>
    %c4 = arith.constant 4 : index
    %c0_100 = arith.constant 0 : index
    %c0_101 = arith.constant 0 : index
    %114 = vector.load %arg2[%c4, %c0_100, %c0_101] : memref<11x128x128xf32, #tpu.memory_space<vmem>>, vector<1x128x128xf32>
    %115 = vector.shape_cast %114 : vector<1x128x128xf32> to vector<128x128xf32>
    %cst_102 = arith.constant dense<0.000000e+00> : vector<16x128xf32>
    %116 = tpu.matmul %113, %115, %cst_102 {dimension_numbers = #tpu.dot_dimension_numbers<[1], [0], [0], [1], [0, 0, 1, 1], [], []>} : vector<16x128xf32>, vector<128x128xf32>, vector<16x128xf32> -> vector<16x128xf32>
    %117 = arith.addf %111, %116 : vector<16x128xf32>
    %c0_103 = arith.constant 0 : index
    %c2_104 = arith.constant 2 : index
    %c0_105 = arith.constant 0 : index
    %118 = vector.load %arg5[%c0_103, %c2_104, %c0_105] : memref<2x18x128xf32, #tpu.memory_space<vmem>>, vector<1x16x128xf32>
    %119 = vector.shape_cast %118 : vector<1x16x128xf32> to vector<16x128xf32>
    %c5 = arith.constant 5 : index
    %c0_106 = arith.constant 0 : index
    %c0_107 = arith.constant 0 : index
    %120 = vector.load %arg2[%c5, %c0_106, %c0_107] : memref<11x128x128xf32, #tpu.memory_space<vmem>>, vector<1x128x128xf32>
    %121 = vector.shape_cast %120 : vector<1x128x128xf32> to vector<128x128xf32>
    %cst_108 = arith.constant dense<0.000000e+00> : vector<16x128xf32>
    %122 = tpu.matmul %119, %121, %cst_108 {dimension_numbers = #tpu.dot_dimension_numbers<[1], [0], [0], [1], [0, 0, 1, 1], [], []>} : vector<16x128xf32>, vector<128x128xf32>, vector<16x128xf32> -> vector<16x128xf32>
    %123 = arith.addf %117, %122 : vector<16x128xf32>
    %c0_109 = arith.constant 0 : index
    %c0_110 = arith.constant 0 : index
    %124 = vector.load %arg3[%c0_109, %c0_110] : memref<3x128xf32, #tpu.memory_space<vmem>>, vector<1x128xf32>
    %125 = vector.broadcast %124 : vector<1x128xf32> to vector<16x128xf32>
    %126 = arith.addf %123, %125 : vector<16x128xf32>
    %127 = vector.extract_strided_slice %126 {offsets = [0, 0], sizes = [15, 128], strides = [1, 1]} : vector<16x128xf32> to vector<15x128xf32>
    %128 = vector.extract_strided_slice %126 {offsets = [1, 0], sizes = [15, 128], strides = [1, 1]} : vector<16x128xf32> to vector<15x128xf32>
    %129 = arith.maximumf %127, %128 : vector<15x128xf32>
    %c10 = arith.constant 10 : index
    %c0_111 = arith.constant 0 : index
    %c0_112 = arith.constant 0 : index
    %130 = vector.load %arg2[%c10, %c0_111, %c0_112] : memref<11x128x128xf32, #tpu.memory_space<vmem>>, vector<1x128x128xf32>
    %131 = vector.shape_cast %130 : vector<1x128x128xf32> to vector<128x128xf32>
    %cst_113 = arith.constant dense<0.000000e+00> : vector<15x128xf32>
    %132 = tpu.matmul %129, %131, %cst_113 {dimension_numbers = #tpu.dot_dimension_numbers<[1], [0], [0], [1], [0, 0, 1, 1], [], []>} : vector<15x128xf32>, vector<128x128xf32>, vector<15x128xf32> -> vector<15x128xf32>
    %133 = arith.maximumf %129, %132 : vector<15x128xf32>
    %c2_114 = arith.constant 2 : index
    %c0_115 = arith.constant 0 : index
    %134 = vector.load %arg3[%c2_114, %c0_115] : memref<3x128xf32, #tpu.memory_space<vmem>>, vector<1x128xf32>
    %135 = vector.broadcast %134 : vector<1x128xf32> to vector<15x128xf32>
    %136 = arith.mulf %133, %135 : vector<15x128xf32>
    %c0_116 = arith.constant 0 : index
    %c1_117 = arith.constant 1 : index
    %c0_118 = arith.constant 0 : index
    %137 = vector.load %arg5[%c0_116, %c1_117, %c0_118] : memref<2x18x128xf32, #tpu.memory_space<vmem>>, vector<1x15x128xf32>
    %138 = vector.shape_cast %137 : vector<1x15x128xf32> to vector<15x128xf32>
    %139 = vector.shape_cast %136 : vector<15x128xf32> to vector<1x15x128xf32>
    tpu.vector_store %arg5[%c0_116, %c1_117, %c0_118], %139 {strides = array<i32>} : memref<2x18x128xf32, #tpu.memory_space<vmem>>, vector<1x15x128xf32>,
    %c0_119 = arith.constant 0 : index
    %c16 = arith.constant 16 : index
    %c0_120 = arith.constant 0 : index
    %140 = vector.load %arg5[%c0_119, %c16, %c0_120] : memref<2x18x128xf32, #tpu.memory_space<vmem>>, vector<1x1x128xf32>
    %141 = vector.shape_cast %140 : vector<1x1x128xf32> to vector<1x128xf32>
    %142 = vector.shape_cast %0 : vector<1x128xf32> to vector<1x1x128xf32>
    tpu.vector_store %arg5[%c0_119, %c16, %c0_120], %142 {strides = array<i32>} : memref<2x18x128xf32, #tpu.memory_space<vmem>>, vector<1x1x128xf32>,
    %c0_121 = arith.constant 0 : index
    %c0_122 = arith.constant 0 : index
    %c0_123 = arith.constant 0 : index
    %143 = vector.load %arg5[%c0_121, %c0_122, %c0_123] : memref<2x18x128xf32, #tpu.memory_space<vmem>>, vector<1x16x128xf32>
    %144 = vector.shape_cast %143 : vector<1x16x128xf32> to vector<16x128xf32>
    %c6 = arith.constant 6 : index
    %c0_124 = arith.constant 0 : index
    %c0_125 = arith.constant 0 : index
    %145 = vector.load %arg2[%c6, %c0_124, %c0_125] : memref<11x128x128xf32, #tpu.memory_space<vmem>>, vector<1x128x128xf32>
    %146 = vector.shape_cast %145 : vector<1x128x128xf32> to vector<128x128xf32>
    %cst_126 = arith.constant dense<0.000000e+00> : vector<16x128xf32>
    %147 = tpu.matmul %144, %146, %cst_126 {dimension_numbers = #tpu.dot_dimension_numbers<[1], [0], [0], [1], [0, 0, 1, 1], [], []>} : vector<16x128xf32>, vector<128x128xf32>, vector<16x128xf32> -> vector<16x128xf32>
    %c0_127 = arith.constant 0 : index
    %c1_128 = arith.constant 1 : index
    %c0_129 = arith.constant 0 : index
    %148 = vector.load %arg5[%c0_127, %c1_128, %c0_129] : memref<2x18x128xf32, #tpu.memory_space<vmem>>, vector<1x16x128xf32>
    %149 = vector.shape_cast %148 : vector<1x16x128xf32> to vector<16x128xf32>
    %c7 = arith.constant 7 : index
    %c0_130 = arith.constant 0 : index
    %c0_131 = arith.constant 0 : index
    %150 = vector.load %arg2[%c7, %c0_130, %c0_131] : memref<11x128x128xf32, #tpu.memory_space<vmem>>, vector<1x128x128xf32>
    %151 = vector.shape_cast %150 : vector<1x128x128xf32> to vector<128x128xf32>
    %cst_132 = arith.constant dense<0.000000e+00> : vector<16x128xf32>
    %152 = tpu.matmul %149, %151, %cst_132 {dimension_numbers = #tpu.dot_dimension_numbers<[1], [0], [0], [1], [0, 0, 1, 1], [], []>} : vector<16x128xf32>, vector<128x128xf32>, vector<16x128xf32> -> vector<16x128xf32>
    %153 = arith.addf %147, %152 : vector<16x128xf32>
    %c0_133 = arith.constant 0 : index
    %c2_134 = arith.constant 2 : index
    %c0_135 = arith.constant 0 : index
    %154 = vector.load %arg5[%c0_133, %c2_134, %c0_135] : memref<2x18x128xf32, #tpu.memory_space<vmem>>, vector<1x16x128xf32>
    %155 = vector.shape_cast %154 : vector<1x16x128xf32> to vector<16x128xf32>
    %c8 = arith.constant 8 : index
    %c0_136 = arith.constant 0 : index
    %c0_137 = arith.constant 0 : index
    %156 = vector.load %arg2[%c8, %c0_136, %c0_137] : memref<11x128x128xf32, #tpu.memory_space<vmem>>, vector<1x128x128xf32>
    %157 = vector.shape_cast %156 : vector<1x128x128xf32> to vector<128x128xf32>
    %cst_138 = arith.constant dense<0.000000e+00> : vector<16x128xf32>
    %158 = tpu.matmul %155, %157, %cst_138 {dimension_numbers = #tpu.dot_dimension_numbers<[1], [0], [0], [1], [0, 0, 1, 1], [], []>} : vector<16x128xf32>, vector<128x128xf32>, vector<16x128xf32> -> vector<16x128xf32>
    %159 = arith.addf %153, %158 : vector<16x128xf32>
    %c1_139 = arith.constant 1 : index
    %c0_140 = arith.constant 0 : index
    %160 = vector.load %arg3[%c1_139, %c0_140] : memref<3x128xf32, #tpu.memory_space<vmem>>, vector<1x128xf32>
    %161 = vector.broadcast %160 : vector<1x128xf32> to vector<16x128xf32>
    %162 = arith.addf %159, %161 : vector<16x128xf32>
    %c0_141 = arith.constant 0 : index
    %c0_142 = arith.constant 0 : index
    %c0_143 = arith.constant 0 : index
    %163 = vector.load %arg4[%c0_141, %c0_142, %c0_143] : memref<2x16x128xf32, #tpu.memory_space<vmem>>, vector<1x16x128xf32>
    %164 = vector.shape_cast %163 : vector<1x16x128xf32> to vector<16x128xf32>
    %165 = vector.shape_cast %162 : vector<16x128xf32> to vector<1x16x128xf32>
    tpu.vector_store %arg4[%c0_141, %c0_142, %c0_143], %165 {strides = array<i32>} : memref<2x16x128xf32, #tpu.memory_space<vmem>>, vector<1x16x128xf32>,
    %166 = vector.broadcast %87 : vector<1x128xf32> to vector<16x128xf32>
    %167 = arith.subf %81, %166 : vector<16x128xf32>
    %168 = vector.broadcast %99 : vector<1x128xf32> to vector<16x128xf32>
    %169 = arith.mulf %167, %168 : vector<16x128xf32>
    %c1_144 = arith.constant 1 : index
    %c1_145 = arith.constant 1 : index
    %c0_146 = arith.constant 0 : index
    %170 = vector.load %arg5[%c1_144, %c1_145, %c0_146] : memref<2x18x128xf32, #tpu.memory_space<vmem>>, vector<1x16x128xf32>
    %171 = vector.shape_cast %170 : vector<1x16x128xf32> to vector<16x128xf32>
    %172 = vector.shape_cast %169 : vector<16x128xf32> to vector<1x16x128xf32>
    tpu.vector_store %arg5[%c1_144, %c1_145, %c0_146], %172 {strides = array<i32>} : memref<2x18x128xf32, #tpu.memory_space<vmem>>, vector<1x16x128xf32>,
    %c1_147 = arith.constant 1 : index
    %c0_148 = arith.constant 0 : index
    %c0_149 = arith.constant 0 : index
    %173 = vector.load %arg5[%c1_147, %c0_148, %c0_149] : memref<2x18x128xf32, #tpu.memory_space<vmem>>, vector<1x16x128xf32>
    %174 = vector.shape_cast %173 : vector<1x16x128xf32> to vector<16x128xf32>
    %c3_150 = arith.constant 3 : index
    %c0_151 = arith.constant 0 : index
    %c0_152 = arith.constant 0 : index
    %175 = vector.load %arg2[%c3_150, %c0_151, %c0_152] : memref<11x128x128xf32, #tpu.memory_space<vmem>>, vector<1x128x128xf32>
    %176 = vector.shape_cast %175 : vector<1x128x128xf32> to vector<128x128xf32>
    %cst_153 = arith.constant dense<0.000000e+00> : vector<16x128xf32>
    %177 = tpu.matmul %174, %176, %cst_153 {dimension_numbers = #tpu.dot_dimension_numbers<[1], [0], [0], [1], [0, 0, 1, 1], [], []>} : vector<16x128xf32>, vector<128x128xf32>, vector<16x128xf32> -> vector<16x128xf32>
    %c1_154 = arith.constant 1 : index
    %c1_155 = arith.constant 1 : index
    %c0_156 = arith.constant 0 : index
    %178 = vector.load %arg5[%c1_154, %c1_155, %c0_156] : memref<2x18x128xf32, #tpu.memory_space<vmem>>, vector<1x16x128xf32>
    %179 = vector.shape_cast %178 : vector<1x16x128xf32> to vector<16x128xf32>
    %c4_157 = arith.constant 4 : index
    %c0_158 = arith.constant 0 : index
    %c0_159 = arith.constant 0 : index
    %180 = vector.load %arg2[%c4_157, %c0_158, %c0_159] : memref<11x128x128xf32, #tpu.memory_space<vmem>>, vector<1x128x128xf32>
    %181 = vector.shape_cast %180 : vector<1x128x128xf32> to vector<128x128xf32>
    %cst_160 = arith.constant dense<0.000000e+00> : vector<16x128xf32>
    %182 = tpu.matmul %179, %181, %cst_160 {dimension_numbers = #tpu.dot_dimension_numbers<[1], [0], [0], [1], [0, 0, 1, 1], [], []>} : vector<16x128xf32>, vector<128x128xf32>, vector<16x128xf32> -> vector<16x128xf32>
    %183 = arith.addf %177, %182 : vector<16x128xf32>
    %c1_161 = arith.constant 1 : index
    %c2_162 = arith.constant 2 : index
    %c0_163 = arith.constant 0 : index
    %184 = vector.load %arg5[%c1_161, %c2_162, %c0_163] : memref<2x18x128xf32, #tpu.memory_space<vmem>>, vector<1x16x128xf32>
    %185 = vector.shape_cast %184 : vector<1x16x128xf32> to vector<16x128xf32>
    %c5_164 = arith.constant 5 : index
    %c0_165 = arith.constant 0 : index
    %c0_166 = arith.constant 0 : index
    %186 = vector.load %arg2[%c5_164, %c0_165, %c0_166] : memref<11x128x128xf32, #tpu.memory_space<vmem>>, vector<1x128x128xf32>
    %187 = vector.shape_cast %186 : vector<1x128x128xf32> to vector<128x128xf32>
    %cst_167 = arith.constant dense<0.000000e+00> : vector<16x128xf32>
    %188 = tpu.matmul %185, %187, %cst_167 {dimension_numbers = #tpu.dot_dimension_numbers<[1], [0], [0], [1], [0, 0, 1, 1], [], []>} : vector<16x128xf32>, vector<128x128xf32>, vector<16x128xf32> -> vector<16x128xf32>
    %189 = arith.addf %183, %188 : vector<16x128xf32>
    %c0_168 = arith.constant 0 : index
    %c0_169 = arith.constant 0 : index
    %190 = vector.load %arg3[%c0_168, %c0_169] : memref<3x128xf32, #tpu.memory_space<vmem>>, vector<1x128xf32>
    %191 = vector.broadcast %190 : vector<1x128xf32> to vector<16x128xf32>
    %192 = arith.addf %189, %191 : vector<16x128xf32>
    %193 = vector.extract_strided_slice %192 {offsets = [0, 0], sizes = [15, 128], strides = [1, 1]} : vector<16x128xf32> to vector<15x128xf32>
    %194 = vector.extract_strided_slice %192 {offsets = [1, 0], sizes = [15, 128], strides = [1, 1]} : vector<16x128xf32> to vector<15x128xf32>
    %195 = arith.maximumf %193, %194 : vector<15x128xf32>
    %c10_170 = arith.constant 10 : index
    %c0_171 = arith.constant 0 : index
    %c0_172 = arith.constant 0 : index
    %196 = vector.load %arg2[%c10_170, %c0_171, %c0_172] : memref<11x128x128xf32, #tpu.memory_space<vmem>>, vector<1x128x128xf32>
    %197 = vector.shape_cast %196 : vector<1x128x128xf32> to vector<128x128xf32>
    %cst_173 = arith.constant dense<0.000000e+00> : vector<15x128xf32>
    %198 = tpu.matmul %195, %197, %cst_173 {dimension_numbers = #tpu.dot_dimension_numbers<[1], [0], [0], [1], [0, 0, 1, 1], [], []>} : vector<15x128xf32>, vector<128x128xf32>, vector<15x128xf32> -> vector<15x128xf32>
    %199 = arith.maximumf %195, %198 : vector<15x128xf32>
    %c2_174 = arith.constant 2 : index
    %c0_175 = arith.constant 0 : index
    %200 = vector.load %arg3[%c2_174, %c0_175] : memref<3x128xf32, #tpu.memory_space<vmem>>, vector<1x128xf32>
    %201 = vector.broadcast %200 : vector<1x128xf32> to vector<15x128xf32>
    %202 = arith.mulf %199, %201 : vector<15x128xf32>
    %c1_176 = arith.constant 1 : index
    %c1_177 = arith.constant 1 : index
    %c0_178 = arith.constant 0 : index
    %203 = vector.load %arg5[%c1_176, %c1_177, %c0_178] : memref<2x18x128xf32, #tpu.memory_space<vmem>>, vector<1x15x128xf32>
    %204 = vector.shape_cast %203 : vector<1x15x128xf32> to vector<15x128xf32>
    %205 = vector.shape_cast %202 : vector<15x128xf32> to vector<1x15x128xf32>
    tpu.vector_store %arg5[%c1_176, %c1_177, %c0_178], %205 {strides = array<i32>} : memref<2x18x128xf32, #tpu.memory_space<vmem>>, vector<1x15x128xf32>,
    %c1_179 = arith.constant 1 : index
    %c16_180 = arith.constant 16 : index
    %c0_181 = arith.constant 0 : index
    %206 = vector.load %arg5[%c1_179, %c16_180, %c0_181] : memref<2x18x128xf32, #tpu.memory_space<vmem>>, vector<1x1x128xf32>
    %207 = vector.shape_cast %206 : vector<1x1x128xf32> to vector<1x128xf32>
    %208 = vector.shape_cast %0 : vector<1x128xf32> to vector<1x1x128xf32>
    tpu.vector_store %arg5[%c1_179, %c16_180, %c0_181], %208 {strides = array<i32>} : memref<2x18x128xf32, #tpu.memory_space<vmem>>, vector<1x1x128xf32>,
    %c1_182 = arith.constant 1 : index
    %c0_183 = arith.constant 0 : index
    %c0_184 = arith.constant 0 : index
    %209 = vector.load %arg5[%c1_182, %c0_183, %c0_184] : memref<2x18x128xf32, #tpu.memory_space<vmem>>, vector<1x16x128xf32>
    %210 = vector.shape_cast %209 : vector<1x16x128xf32> to vector<16x128xf32>
    %c6_185 = arith.constant 6 : index
    %c0_186 = arith.constant 0 : index
    %c0_187 = arith.constant 0 : index
    %211 = vector.load %arg2[%c6_185, %c0_186, %c0_187] : memref<11x128x128xf32, #tpu.memory_space<vmem>>, vector<1x128x128xf32>
    %212 = vector.shape_cast %211 : vector<1x128x128xf32> to vector<128x128xf32>
    %cst_188 = arith.constant dense<0.000000e+00> : vector<16x128xf32>
    %213 = tpu.matmul %210, %212, %cst_188 {dimension_numbers = #tpu.dot_dimension_numbers<[1], [0], [0], [1], [0, 0, 1, 1], [], []>} : vector<16x128xf32>, vector<128x128xf32>, vector<16x128xf32> -> vector<16x128xf32>
    %c1_189 = arith.constant 1 : index
    %c1_190 = arith.constant 1 : index
    %c0_191 = arith.constant 0 : index
    %214 = vector.load %arg5[%c1_189, %c1_190, %c0_191] : memref<2x18x128xf32, #tpu.memory_space<vmem>>, vector<1x16x128xf32>
    %215 = vector.shape_cast %214 : vector<1x16x128xf32> to vector<16x128xf32>
    %c7_192 = arith.constant 7 : index
    %c0_193 = arith.constant 0 : index
    %c0_194 = arith.constant 0 : index
    %216 = vector.load %arg2[%c7_192, %c0_193, %c0_194] : memref<11x128x128xf32, #tpu.memory_space<vmem>>, vector<1x128x128xf32>
    %217 = vector.shape_cast %216 : vector<1x128x128xf32> to vector<128x128xf32>
    %cst_195 = arith.constant dense<0.000000e+00> : vector<16x128xf32>
    %218 = tpu.matmul %215, %217, %cst_195 {dimension_numbers = #tpu.dot_dimension_numbers<[1], [0], [0], [1], [0, 0, 1, 1], [], []>} : vector<16x128xf32>, vector<128x128xf32>, vector<16x128xf32> -> vector<16x128xf32>
    %219 = arith.addf %213, %218 : vector<16x128xf32>
    %c1_196 = arith.constant 1 : index
    %c2_197 = arith.constant 2 : index
    %c0_198 = arith.constant 0 : index
    %220 = vector.load %arg5[%c1_196, %c2_197, %c0_198] : memref<2x18x128xf32, #tpu.memory_space<vmem>>, vector<1x16x128xf32>
    %221 = vector.shape_cast %220 : vector<1x16x128xf32> to vector<16x128xf32>
    %c8_199 = arith.constant 8 : index
    %c0_200 = arith.constant 0 : index
    %c0_201 = arith.constant 0 : index
    %222 = vector.load %arg2[%c8_199, %c0_200, %c0_201] : memref<11x128x128xf32, #tpu.memory_space<vmem>>, vector<1x128x128xf32>
    %223 = vector.shape_cast %222 : vector<1x128x128xf32> to vector<128x128xf32>
    %cst_202 = arith.constant dense<0.000000e+00> : vector<16x128xf32>
    %224 = tpu.matmul %221, %223, %cst_202 {dimension_numbers = #tpu.dot_dimension_numbers<[1], [0], [0], [1], [0, 0, 1, 1], [], []>} : vector<16x128xf32>, vector<128x128xf32>, vector<16x128xf32> -> vector<16x128xf32>
    %225 = arith.addf %219, %224 : vector<16x128xf32>
    %c1_203 = arith.constant 1 : index
    %c0_204 = arith.constant 0 : index
    %226 = vector.load %arg3[%c1_203, %c0_204] : memref<3x128xf32, #tpu.memory_space<vmem>>, vector<1x128xf32>
    %227 = vector.broadcast %226 : vector<1x128xf32> to vector<16x128xf32>
    %228 = arith.addf %225, %227 : vector<16x128xf32>
    %c1_205 = arith.constant 1 : index
    %c0_206 = arith.constant 0 : index
    %c0_207 = arith.constant 0 : index
    %229 = vector.load %arg4[%c1_205, %c0_206, %c0_207] : memref<2x16x128xf32, #tpu.memory_space<vmem>>, vector<1x16x128xf32>
    %230 = vector.shape_cast %229 : vector<1x16x128xf32> to vector<16x128xf32>
    %231 = vector.shape_cast %228 : vector<16x128xf32> to vector<1x16x128xf32>
    tpu.vector_store %arg4[%c1_205, %c0_206, %c0_207], %231 {strides = array<i32>} : memref<2x16x128xf32, #tpu.memory_space<vmem>>, vector<1x16x128xf32>,
    return
  }
  func.func @transform_0(%arg0: i32) -> (i32, i32, i32) {
    %c0_i32 = arith.constant 0 : i32
    %c0_i32_0 = arith.constant 0 : i32
    %c0_i32_1 = arith.constant 0 : i32
    %c0_i32_2 = arith.constant 0 : i32
    return %c0_i32, %c0_i32_0, %c0_i32_1 : i32, i32, i32
  }
  func.func @transform_1(%arg0: i32) -> (i32, i32, i32) {
    %c0_i32 = arith.constant 0 : i32
    %c0_i32_0 = arith.constant 0 : i32
    %c0_i32_1 = arith.constant 0 : i32
    %c0_i32_2 = arith.constant 0 : i32
    return %c0_i32, %c0_i32_0, %c0_i32_1 : i32, i32, i32
  }
  func.func @transform_2(%arg0: i32) -> (i32, i32) {
    %c0_i32 = arith.constant 0 : i32
    %c0_i32_0 = arith.constant 0 : i32
    %c0_i32_1 = arith.constant 0 : i32
    return %c0_i32, %c0_i32_0 : i32, i32
  }
  func.func @transform_3(%arg0: i32) -> (i32, i32, i32) {
    %c0_i32 = arith.constant 0 : i32
    %c0_i32_0 = arith.constant 0 : i32
    %c0_i32_1 = arith.constant 0 : i32
    %c0_i32_2 = arith.constant 0 : i32
    return %c0_i32, %c0_i32_0, %c0_i32_1 : i32, i32, i32
  }
}

</mosaic_0001>

<bundles_post_ra>
// kernel: combined_net_forward.1
= control target key start
LH: loop header
LB: loop body
LE: loop exit
PB: predicated region body
PF: predicated region fallthrough
CT: control target
= control target key end

     0   :  { %8 = vsyncpa [#allocation4], 0  ;;  %s4437_s12 = smov [#allocation3]   ;;  %s5138_s0 = inlined_call_operand.vmem [shape: f32[2,16,128], index: 0, kind: input, shape index: {}]   ;;  %s5139_s1 = inlined_call_operand.hbm [shape: f32[11,128,128], index: 1, kind: input, shape index: {}]   ;;  %s5140_s2 = inlined_call_operand.vmem [shape: f32[3,128], index: 2, kind: input, shape index: {}]   ;;  %s5141_s3 = inlined_call_operand.vmem [shape: f32[2,16,128], index: 3, kind: output, shape index: {}]  }
   0x1   :  { %s16_s13 = sshll.u32 %s4437_s12, 4  ;;  %s4413_s16 = scalar_lea.hbm %s5139_s1, 22528  ;;  %s17_s13 = int_to_ptr.vmem [resolvable:$true] %s16_s13 }
   0x2   :  { %p4414_p0 = scmp.ne.s32.totalorder %s5139_s1, %s4413_s16  ;;  %p4417_p1 = scmp.lt.u32.totalorder %s4413_s16, %s5139_s1 }
   0x4   :  { %p4419_p2 = pnand %p4417_p1, %p4414_p0 }
   0x6   :  { %4422 = shalt.err (!%p4419_p2)
}
   0x7   :  { %s4423_s21 = scalar_lea.vmem %s17_s13, 22528  ;;  %p4428_p4 = scmp.lt.s32.totalorder %s17_s13, %s17_s13 }
   0x8   :  { %p4424_p3 = scmp.ne.s32.totalorder %s17_s13, %s4423_s21  ;;  %p4429_p5 = scmp.lt.s32.totalorder %s4423_s21, %s4423_s21 }
   0xa   :  { %p4430_p6 = por %p4429_p5, %p4428_p4 }
   0xc   :  { %p4431_p7 = pnand %p4430_p6, %p4424_p3 }
   0xe   :  { %4434 = shalt.err (!%p4431_p7)
}
   0xf   :  { %s4438_s22 = smov 128   ;;  %s4439_s23 = smov 8  }
  0x10   :  { %22 = dma.hbm_to_vmem [thread:$0]  %s5139_s1, 22528, %s17_s13, [#allocation4], %s4438_s22, %s4438_s22, %s4439_s23  }
  0x11   :  { %4435 = dma.done.wait [#allocation4], 22528  }
  0x12   :  { %4436 = vsyncadd [#allocation4], 4294944768  ;;  %v4440_v0 = vmov 0.0   ;;  %v63_v1 = vld [vmem:[#allocation3 + $0x80] sm:$0xff]  ;;  %v64_v2 = vld [vmem:[#allocation3 + $0x88] sm:$0xff]  ;;  %vm1226_vm4 = vcmask 1046528  }
  0x13   :  { %28 = vst [vmem:[#allocation2] sm:$0x1] %v4440_v0  ;;  %29 = vst [vmem:[#allocation2 + $0x11] sm:$0x1] %v4440_v0  ;;  %v65_v3 = vld [vmem:[#allocation3 + $0x90] sm:$0xff]  ;;  %v4477_v4 = vpack.c.bf16 %v64_v2, %v63_v1  ;;  %v66_v5 = vld [vmem:[#allocation3 + $0x98] sm:$0xff] }
  0x14   :  { %35 = vst [vmem:[#allocation2 + $0x18] sm:$0x1] %v4440_v0  ;;  %36 = vst [vmem:[#allocation2 + $0x29] sm:$0x1] %v4440_v0  ;;  %v4479_v6 = vpack.c.bf16 %v66_v5, %v65_v3  ;;  %v67_v7 = vld [vmem:[#allocation3 + $0xa0] sm:$0xff]  ;;  %v68_v8 = vld [vmem:[#allocation3 + $0xa8] sm:$0xff] }
  0x15   :  { %3616 = vmatprep.subr.bf16.mxu0 %v4477_v4  ;;  %v4484_v9 = vpack.c.bf16 %v68_v8, %v67_v7  ;;  %v30_v10 = vld [vmem:[%s5138_s0] sm:$0xff]  ;;  %v70_v12 = vld [vmem:[#allocation3 + $0xb8] sm:$0xff]  ;;  %v71_v15 = vld [vmem:[#allocation3 + $0xc0] sm:$0xff] }
  0x16   :  { %3618 = vmatpush3.bf16.msra.mxu0 %v4477_v4  ;;  %v69_v11 = vld [vmem:[#allocation3 + $0xb0] sm:$0xff]  ;;  %32 = vst [vmem:[#allocation2 + $0x1] sm:$0xff] %v30_v10  ;;  %2807 = vmatprep.mubr.f32.mxu0 %v30_v10  ;;  %v31_v13 = vld [vmem:[%s5138_s0 + $0x8] sm:$0xff]  ;;  %v72_v16 = vld [vmem:[#allocation3 + $0xc8] sm:$0xff] }
  0x17   :  { %3620 = vmatprep.subr.bf16.mxu0 %v4479_v6  ;;  %33 = vst [vmem:[#allocation2 + $0x9] sm:$0xff] %v31_v13  ;;  %v4494_v14 = vpack.c.bf16 %v70_v12, %v69_v11  ;;  %v4498_v17 = vpack.c.bf16 %v72_v16, %v71_v15  ;;  %v73_v18 = vld [vmem:[#allocation3 + $0xd0] sm:$0xff]  ;;  %v74_v19 = vld [vmem:[#allocation3 + $0xd8] sm:$0xff]  ;;  %v75_v21 = vld [vmem:[#allocation3 + $0xe0] sm:$0xff] }
  0x18   :  { %v4502_v20 = vpack.c.bf16 %v74_v19, %v73_v18  ;;  %v76_v22 = vld [vmem:[#allocation3 + $0xe8] sm:$0xff]  ;;  %v332_v23 = vld [vmem:[#allocation3 + $0x480] sm:$0xff]  ;;  %v334_v25 = vld [vmem:[#allocation3 + $0x490] sm:$0xff] }
  0x19   :  { %v333_v24 = vld [vmem:[#allocation3 + $0x488] sm:$0xff]  ;;  %v335_v27 = vld [vmem:[#allocation3 + $0x498] sm:$0xff]  ;;  %v336_v29 = vld [vmem:[#allocation3 + $0x4a0] sm:$0xff]  ;;  %v4510_v31 = vpack.c.bf16 %v76_v22, %v75_v21 }
  0x1a   :  { %3622 = vmatpush3.bf16.msra.mxu0 %v4479_v6  ;;  %v4504_v26 = vpack.c.bf16 %v333_v24, %v332_v23  ;;  %v4507_v28 = vpack.c.bf16 %v335_v27, %v334_v25  ;;  %v337_v30 = vld [vmem:[#allocation3 + $0x4a8] sm:$0xff]  ;;  %v77_v32 = vld [vmem:[#allocation3 + $0xf0] sm:$0xff]  ;;  %v78_v33 = vld [vmem:[#allocation3 + $0xf8] sm:$0xff] }
  0x1b   :  { %3624 = vmatprep.subr.bf16.mxu0 %v4484_v9  ;;  %v4515_v34 = vpack.c.bf16 %v337_v30, %v336_v29  ;;  %v338_v35 = vld [vmem:[#allocation3 + $0x4b0] sm:$0xff]  ;;  %v339_v36 = vld [vmem:[#allocation3 + $0x4b8] sm:$0xff]  ;;  %v4519_v37 = vpack.c.bf16 %v78_v33, %v77_v32  ;;  %v44_v38 = vld [vmem:[#allocation3] sm:$0xff] }
  0x1c   :  { %3744 = vmatprep.subr.bf16.mxu1 %v4504_v26  ;;  %v45_v39 = vld [vmem:[#allocation3 + $0x8] sm:$0xff]  ;;  %v4523_v40 = vpack.c.bf16 %v339_v36, %v338_v35  ;;  %v340_v41 = vld [vmem:[#allocation3 + $0x4c0] sm:$0xff]  ;;  %v46_v44 = vld [vmem:[#allocation3 + $0x10] sm:$0xff] }
  0x1d   :  { %3746 = vmatpush3.bf16.msra.mxu1 %v4504_v26  ;;  %v341_v42 = vld [vmem:[#allocation3 + $0x4c8] sm:$0xff]  ;;  %v4527_v43 = vpack.c.bf16 %v45_v39, %v44_v38  ;;  %v47_v45 = vld [vmem:[#allocation3 + $0x18] sm:$0xff]  ;;  %v342_v47 = vld [vmem:[#allocation3 + $0x4d0] sm:$0xff] }
  0x1e   :  { %3626 = vmatpush3.bf16.msra.mxu0 %v4484_v9  ;;  %3748 = vmatprep.subr.bf16.mxu1 %v4507_v28  ;;  %v4531_v46 = vpack.c.bf16 %v341_v42, %v340_v41  ;;  %v343_v48 = vld [vmem:[#allocation3 + $0x4d8] sm:$0xff]  ;;  %v4535_v49 = vpack.c.bf16 %v47_v45, %v46_v44  ;;  %v42_v50 = vld [vmem:[#allocation2] sm:$0xff]  ;;  %v48_v51 = vld [vmem:[#allocation3 + $0x20] sm:$0xff] }
  0x1f   :  { %3628 = vmatprep.subr.bf16.mxu0 %v4494_v14  ;;  %v49_v52 = vld [vmem:[#allocation3 + $0x28] sm:$0xff]  ;;  %v4539_v53 = vpack.c.bf16 %v343_v48, %v342_v47  ;;  %v344_v54 = vld [vmem:[#allocation3 + $0x4e0] sm:$0xff]  ;;  %v50_v57 = vld [vmem:[#allocation3 + $0x30] sm:$0xff] }
  0x20   :  { %v345_v55 = vld [vmem:[#allocation3 + $0x4e8] sm:$0xff]  ;;  %v4543_v56 = vpack.c.bf16 %v49_v52, %v48_v51  ;;  %v51_v58 = vld [vmem:[#allocation3 + $0x38] sm:$0xff]  ;;  %v52_v61 = vld [vmem:[#allocation3 + $0x40] sm:$0xff] }
  0x21   :  { %3750 = vmatpush3.bf16.msra.mxu1 %v4507_v28  ;;  %v4547_v59 = vpack.c.bf16 %v345_v55, %v344_v54  ;;  %v4551_v60 = vpack.c.bf16 %v51_v58, %v50_v57  ;;  %v53_v62 = vld [vmem:[#allocation3 + $0x48] sm:$0xff]  ;;  %v54_v1 = vld [vmem:[#allocation3 + $0x50] sm:$0xff]  ;;  %v55_v2 = vld [vmem:[#allocation3 + $0x58] sm:$0xff] }
  0x22   :  { %3630 = vmatpush3.bf16.msra.mxu0 %v4494_v14  ;;  %3752 = vmatprep.subr.bf16.mxu1 %v4515_v34  ;;  %v4557_v63 = vpack.c.bf16 %v53_v62, %v52_v61  ;;  %v4562_v3 = vpack.c.bf16 %v55_v2, %v54_v1  ;;  %v56_v5 = vld [vmem:[#allocation3 + $0x60] sm:$0xff]  ;;  %v57_v7 = vld [vmem:[#allocation3 + $0x68] sm:$0xff]  ;;  %v58_v10 = vld [vmem:[#allocation3 + $0x70] sm:$0xff] }
  0x23   :  { %3632 = vmatprep.subr.bf16.mxu0 %v4498_v17  ;;  %v4566_v8 = vpack.c.bf16 %v57_v7, %v56_v5  ;;  %v59_v11 = vld [vmem:[#allocation3 + $0x78] sm:$0xff]  ;;  %v233_v15 = vld [vmem:[#allocation3 + $0x108] sm:$0xff]  ;;  %v234_v18 = vld [vmem:[#allocation3 + $0x110] sm:$0xff] }
  0x24   :  { %v4570_v12 = vpack.c.bf16 %v59_v11, %v58_v10  ;;  %v235_v19 = vld [vmem:[#allocation3 + $0x118] sm:$0xff]  ;;  %v236_v24 = vld [vmem:[#allocation3 + $0x120] sm:$0xff]  ;;  %v237_v25 = vld [vmem:[#allocation3 + $0x128] sm:$0xff] }
  0x25   :  { %3754 = vmatpush3.bf16.msra.mxu1 %v4515_v34  ;;  %v43_v21 = vld [vmem:[#allocation2 + $0x8] sm:$0xff]  ;;  %v4578_v22 = vpack.c.bf16 %v235_v19, %v234_v18  ;;  %v4582_v27 = vpack.c.bf16 %v237_v25, %v236_v24  ;;  %v238_v29 = vld [vmem:[#allocation3 + $0x130] sm:$0xff]  ;;  %v240_v33 = vld [vmem:[#allocation3 + $0x140] sm:$0xff] }
  0x26   :  { %3634 = vmatpush3.bf16.msra.mxu0 %v4498_v17  ;;  %3756 = vmatprep.subr.bf16.mxu1 %v4523_v40  ;;  %v229_v23 = vld [vmem:[#allocation2 + $0x2] sm:$0xff]  ;;  %v241_v35 = vld [vmem:[#allocation3 + $0x148] sm:$0xff]  ;;  %v244_v42 = vld [vmem:[#allocation3 + $0x160] sm:$0xff] }
  0x27   :  { %3636 = vmatprep.subr.bf16.mxu0 %v4502_v20  ;;  %v239_v30 = vld [vmem:[#allocation3 + $0x138] sm:$0xff]  ;;  %v4590_v36 = vpack.c.bf16 %v241_v35, %v240_v33  ;;  %v242_v38 = vld [vmem:[#allocation3 + $0x150] sm:$0xff]  ;;  %v245_v44 = vld [vmem:[#allocation3 + $0x168] sm:$0xff] }
  0x28   :  { %v4586_v32 = vpack.c.bf16 %v239_v30, %v238_v29  ;;  %v243_v39 = vld [vmem:[#allocation3 + $0x158] sm:$0xff]  ;;  %v4598_v45 = vpack.c.bf16 %v245_v44, %v244_v42  ;;  %v246_v47 = vld [vmem:[#allocation3 + $0x170] sm:$0xff]  ;;  %v2333_v57 = vld [vmem:[%s5138_s0 + $0x10] sm:$0xff] }
  0x29   :  { %3758 = vmatpush3.bf16.msra.mxu1 %v4523_v40  ;;  %v4594_v41 = vpack.c.bf16 %v243_v39, %v242_v38  ;;  %v247_v48 = vld [vmem:[#allocation3 + $0x178] sm:$0xff]  ;;  %v346_v52 = vld [vmem:[#allocation3 + $0x4f0] sm:$0xff]  ;;  %40 = vst [vmem:[#allocation2 + $0x19] sm:$0xff] %v2333_v57  ;;  %v2334_v58 = vld [vmem:[%s5138_s0 + $0x18] sm:$0xff] }
  0x2a   :  { %3638 = vmatpush3.bf16.msra.mxu0 %v4502_v20  ;;  %3760 = vmatprep.subr.bf16.mxu1 %v4531_v46  ;;  %v230_v51 = vld [vmem:[#allocation2 + $0xa] sm:$0xff]  ;;  %41 = vst [vmem:[#allocation2 + $0x21] sm:$0xff] %v2334_v58  ;;  %v961_v19 = vld [vmem:[#allocation3 + $0x230] sm:$0xff]  ;;  %v964_v24 = vld [vmem:[#allocation3 + $0x248] sm:$0xff] }
  0x2b   :  { %3640 = vmatprep.subr.bf16.mxu0 %v4510_v31  ;;  %v347_v54 = vld [vmem:[#allocation3 + $0x4f8] sm:$0xff]  ;;  %v968_v33 = vld [vmem:[#allocation3 + $0x268] sm:$0xff] }
  0x2c   :  { %v4621_v55 = vpack.c.bf16 %v347_v54, %v346_v52  ;;  %v966_v29 = vld [vmem:[#allocation3 + $0x258] sm:$0xff]  ;;  %v937_v42 = vld [vmem:[#allocation3 + $0x188] sm:$0xff] }
  0x2d   :  { %3762 = vmatpush3.bf16.msra.mxu1 %v4531_v46  ;;  %v970_v38 = vld [vmem:[#allocation3 + $0x278] sm:$0xff] }
  0x2e   :  { %3642 = vmatpush3.bf16.msra.mxu0 %v4510_v31  ;;  %3764 = vmatprep.subr.bf16.mxu1 %v4539_v53 }
  0x2f   :  { %3644 = vmatprep.subr.bf16.mxu0 %v4519_v37 }
  0x31   :  { %3766 = vmatpush3.bf16.msra.mxu1 %v4539_v53 }
  0x32   :  { %3646 = vmatpush3.bf16.msra.mxu0 %v4519_v37  ;;  %3768 = vmatprep.subr.bf16.mxu1 %v4547_v59 }
  0x33   :  { %3648 = vmatprep.subr.bf16.mxu0 %v4527_v43 }
  0x35   :  { %2808 = vmatmul.mubr.f32.vlgmr.msra.gmra.mrb[0].mxu0 %v31_v13  ;;  %3770 = vmatpush3.bf16.msra.mxu1 %v4547_v59  ;;  %v232_v13 = vld [vmem:[#allocation3 + $0x100] sm:$0xff] }
  0x36   :  { %3650 = vmatpush3.bf16.msra.mxu0 %v4527_v43  ;;  %2842 = vmatprep.mubr.f32.mxu0 %v42_v50  ;;  %v4574_v16 = vpack.c.bf16 %v233_v15, %v232_v13  ;;  %v4602_v50 = vpack.c.bf16 %v247_v48, %v246_v47 }
  0x37   :  { %3652 = vmatprep.subr.bf16.mxu0 %v4535_v49  ;;  %3772 = vmatprep.subr.bf16.mxu1 %v4621_v55 }
  0x39   :  { %3774 = vmatpush3.bf16.msra.mxu1 %v4621_v55 }
  0x3a   :  { %3654 = vmatpush3.bf16.msra.mxu0 %v4535_v49  ;;  %3776 = vmatprep.subr.bf16.mxu1 %v4477_v4 }
  0x3b   :  { %3656 = vmatprep.subr.bf16.mxu0 %v4543_v56 }
  0x3e   :  { %3658 = vmatpush3.bf16.msra.mxu0 %v4543_v56 }
  0x3f   :  { %3660 = vmatprep.subr.bf16.mxu0 %v4551_v60 }
  0x42   :  { %3662 = vmatpush3.bf16.msra.mxu0 %v4551_v60 }
  0x43   :  { %3664 = vmatprep.subr.bf16.mxu0 %v4557_v63 }
  0x46   :  { %3666 = vmatpush3.bf16.msra.mxu0 %v4557_v63 }
  0x47   :  { %3668 = vmatprep.subr.bf16.mxu0 %v4562_v3 }
  0x4a   :  { %3670 = vmatpush3.bf16.msra.mxu0 %v4562_v3 }
  0x4b   :  { %3672 = vmatprep.subr.bf16.mxu0 %v4566_v8 }
  0x4e   :  { %3674 = vmatpush3.bf16.msra.mxu0 %v4566_v8 }
  0x4f   :  { %3676 = vmatprep.subr.bf16.mxu0 %v4570_v12 }
  0x52   :  { %3678 = vmatpush3.bf16.msra.mxu0 %v4570_v12 }
  0x53   :  { %3680 = vmatprep.subr.bf16.mxu0 %v4574_v16 }
  0x55   :  { %2843 = vmatmul.mubr.f32.vlgmr.msra.gmra.mrb[0].mxu0 %v43_v21  ;;  %v962_v21 = vld [vmem:[#allocation3 + $0x238] sm:$0xff] }
  0x56   :  { %3682 = vmatpush3.bf16.msra.mxu0 %v4574_v16  ;;  %2877 = vmatprep.mubr.f32.mxu0 %v229_v23  ;;  %v963_v23 = vld [vmem:[#allocation3 + $0x240] sm:$0xff] }
  0x57   :  { %3684 = vmatprep.subr.bf16.mxu0 %v4578_v22  ;;  %v4753_v25 = vpack.c.bf16 %v964_v24, %v963_v23  ;;  %v939_v23 = vld [vmem:[#allocation3 + $0x198] sm:$0xff] }
  0x5a   :  { %3686 = vmatpush3.bf16.msra.mxu0 %v4578_v22 }
  0x5b   :  { %3688 = vmatprep.subr.bf16.mxu0 %v4582_v27 }
  0x5e   :  { %3690 = vmatpush3.bf16.msra.mxu0 %v4582_v27 }
  0x5f   :  { %3692 = vmatprep.subr.bf16.mxu0 %v4586_v32 }
  0x62   :  { %3694 = vmatpush3.bf16.msra.mxu0 %v4586_v32 }
  0x63   :  { %3696 = vmatprep.subr.bf16.mxu0 %v4590_v36 }
  0x66   :  { %3698 = vmatpush3.bf16.msra.mxu0 %v4590_v36 }
  0x67   :  { %3700 = vmatprep.subr.bf16.mxu0 %v4594_v41 }
  0x6a   :  { %3702 = vmatpush3.bf16.msra.mxu0 %v4594_v41 }
  0x6b   :  { %3704 = vmatprep.subr.bf16.mxu0 %v4598_v45 }
  0x6e   :  { %3706 = vmatpush3.bf16.msra.mxu0 %v4598_v45 }
  0x6f   :  { %3708 = vmatprep.subr.bf16.mxu0 %v4602_v50 }
  0x72   :  { %3710 = vmatpush3.bf16.msra.mxu0 %v4602_v50 }
  0x73   :  { %3712 = vmatprep.subr.bf16.mxu0 %v4504_v26 }
  0x75   :  { %2878 = vmatmul.mubr.f32.vlgmr.msra.gmra.mrb[0].mxu0 %v230_v51 }
  0x76   :  { %3714 = vmatpush3.bf16.msra.mxu0 %v4504_v26 }
  0x77   :  { %3716 = vmatprep.subr.bf16.mxu0 %v4507_v28 }
  0x7a   :  { %3718 = vmatpush3.bf16.msra.mxu0 %v4507_v28 }
  0x7b   :  { %3720 = vmatprep.subr.bf16.mxu0 %v4515_v34 }
  0x7e   :  { %3722 = vmatpush3.bf16.msra.mxu0 %v4515_v34 }
  0x7f   :  { %3724 = vmatprep.subr.bf16.mxu0 %v4523_v40 }
  0x82   :  { %3726 = vmatpush3.bf16.msra.mxu0 %v4523_v40 }
  0x83   :  { %3728 = vmatprep.subr.bf16.mxu0 %v4531_v46 }
  0x86   :  { %3730 = vmatpush3.bf16.msra.mxu0 %v4531_v46 }
  0x87   :  { %3732 = vmatprep.subr.bf16.mxu0 %v4539_v53 }
  0x8a   :  { %3734 = vmatpush3.bf16.msra.mxu0 %v4539_v53 }
  0x8b   :  { %3736 = vmatprep.subr.bf16.mxu0 %v4547_v59 }
  0x8e   :  { %3738 = vmatpush3.bf16.msra.mxu0 %v4547_v59 }
  0x8f   :  { %3740 = vmatprep.subr.bf16.mxu0 %v4621_v55 }
  0x92   :  { %3742 = vmatpush3.bf16.msra.mxu0 %v4621_v55 }
  0x93   :  { %3872 = vmatprep.subr.bf16.mxu0 %v4504_v26 }
 0x148   :  { %v2879_v61 = vpop.f32.mrb[0].mxu0 }
 0x149   :  { %vm326_vm0 = vcmp.gt.f32.partialorder %v2879_v61, 0.0  ;;  %v328_v62 = vmul.f32 0.1, %v2879_v61  ;;  %v314_v1 = vpop.f32.mrb[1].mxu0 }
 0x14a   :  { %vm325_vm1 = vcmp.gt.f32.partialorder %v314_v1, 0.0  ;;  %v327_v2 = vmul.f32 0.1, %v314_v1 }
 0x14b   :  { %v4635_v5 = vsel %vm326_vm0, %v2879_v61, %v328_v62 }
 0x14c   :  { %v4637_v7 = vsel %vm325_vm1, %v314_v1, %v327_v2  ;;  %v432_v11 = vmul.f32 %v4635_v5, %v4635_v5 }
 0x14d   :  { %2912 = vmatprep.mubr.f32.mxu0 %v4637_v7  ;;  %v431_v10 = vmul.f32 %v4637_v7, %v4637_v7 }
 0x14e   :  { %2913 = vmatmul.mubr.f32.vlgmr.msra.gmra.mrb[2].mxu0 %v4635_v5 }
 0x14f   :  { %2947 = vmatprep.mubr.f32.mxu1 %v431_v10  ;;  %3874 = vmatpush3.bf16.msra.mxu0 %v4504_v26 }
 0x150   :  { %2948 = vmatmul.mubr.f32.vlgmr.msra.gmra.mrb[0].mxu1 %v432_v11  ;;  %3876 = vmatprep.subr.bf16.mxu0 %v4507_v28 }
 0x151   :  { %3778 = vmatpush3.bf16.msra.mxu1 %v4477_v4  ;;  %2982 = vmatprep.mubr.f32.mxu1 %v2333_v57  ;;  %v516_v4 = vld [vmem:[#allocation2 + $0x18] sm:$0xff] }
 0x152   :  { %3780 = vmatprep.subr.bf16.mxu1 %v4479_v6 }
 0x153   :  { %3878 = vmatpush3.bf16.msra.mxu0 %v4507_v28 }
 0x154   :  { %3880 = vmatprep.subr.bf16.mxu0 %v4515_v34 }
 0x155   :  { %3782 = vmatpush3.bf16.msra.mxu1 %v4479_v6  ;;  %v517_v6 = vld [vmem:[#allocation2 + $0x20] sm:$0xff] }
 0x156   :  { %3784 = vmatprep.subr.bf16.mxu1 %v4484_v9 }
 0x157   :  { %3882 = vmatpush3.bf16.msra.mxu0 %v4515_v34 }
 0x158   :  { %3884 = vmatprep.subr.bf16.mxu0 %v4523_v40 }
 0x159   :  { %3786 = vmatpush3.bf16.msra.mxu1 %v4484_v9  ;;  %v670_v9 = vld [vmem:[#allocation2 + $0x1a] sm:$0xff] }
 0x15a   :  { %3788 = vmatprep.subr.bf16.mxu1 %v4494_v14 }
 0x15b   :  { %3886 = vmatpush3.bf16.msra.mxu0 %v4523_v40 }
 0x15c   :  { %3888 = vmatprep.subr.bf16.mxu0 %v4531_v46 }
 0x15d   :  { %3790 = vmatpush3.bf16.msra.mxu1 %v4494_v14  ;;  %v671_v14 = vld [vmem:[#allocation2 + $0x22] sm:$0xff] }
 0x15e   :  { %3792 = vmatprep.subr.bf16.mxu1 %v4498_v17 }
 0x15f   :  { %3890 = vmatpush3.bf16.msra.mxu0 %v4531_v46 }
 0x160   :  { %3892 = vmatprep.subr.bf16.mxu0 %v4539_v53 }
 0x161   :  { %3794 = vmatpush3.bf16.msra.mxu1 %v4498_v17 }
 0x162   :  { %3796 = vmatprep.subr.bf16.mxu1 %v4502_v20 }
 0x163   :  { %3894 = vmatpush3.bf16.msra.mxu0 %v4539_v53 }
 0x164   :  { %3896 = vmatprep.subr.bf16.mxu0 %v4547_v59 }
 0x165   :  { %3798 = vmatpush3.bf16.msra.mxu1 %v4502_v20 }
 0x166   :  { %3800 = vmatprep.subr.bf16.mxu1 %v4510_v31 }
 0x167   :  { %3898 = vmatpush3.bf16.msra.mxu0 %v4547_v59 }
 0x168   :  { %3900 = vmatprep.subr.bf16.mxu0 %v4621_v55 }
 0x169   :  { %3802 = vmatpush3.bf16.msra.mxu1 %v4510_v31 }
 0x16a   :  { %3804 = vmatprep.subr.bf16.mxu1 %v4519_v37 }
 0x16b   :  { %3902 = vmatpush3.bf16.msra.mxu0 %v4621_v55 }
 0x16c   :  { %3904 = vmatprep.subr.bf16.mxu0 %v4504_v26 }
 0x16d   :  { %3806 = vmatpush3.bf16.msra.mxu1 %v4519_v37 }
 0x16e   :  { %3808 = vmatprep.subr.bf16.mxu1 %v4527_v43 }
 0x170   :  { %2983 = vmatmul.mubr.f32.vlgmr.msra.gmra.mrb[2].mxu1 %v2334_v58 }
 0x171   :  { %3810 = vmatpush3.bf16.msra.mxu1 %v4527_v43  ;;  %3017 = vmatprep.mubr.f32.mxu1 %v516_v4 }
 0x172   :  { %3812 = vmatprep.subr.bf16.mxu1 %v4535_v49 }
 0x175   :  { %3814 = vmatpush3.bf16.msra.mxu1 %v4535_v49 }
 0x176   :  { %3816 = vmatprep.subr.bf16.mxu1 %v4543_v56 }
 0x179   :  { %3818 = vmatpush3.bf16.msra.mxu1 %v4543_v56 }
 0x17a   :  { %3820 = vmatprep.subr.bf16.mxu1 %v4551_v60 }
 0x17d   :  { %3822 = vmatpush3.bf16.msra.mxu1 %v4551_v60 }
 0x17e   :  { %3824 = vmatprep.subr.bf16.mxu1 %v4557_v63 }
 0x181   :  { %3826 = vmatpush3.bf16.msra.mxu1 %v4557_v63 }
 0x182   :  { %3828 = vmatprep.subr.bf16.mxu1 %v4562_v3 }
 0x185   :  { %3830 = vmatpush3.bf16.msra.mxu1 %v4562_v3 }
 0x186   :  { %3832 = vmatprep.subr.bf16.mxu1 %v4566_v8 }
 0x189   :  { %3834 = vmatpush3.bf16.msra.mxu1 %v4566_v8 }
 0x18a   :  { %3836 = vmatprep.subr.bf16.mxu1 %v4570_v12 }
 0x18d   :  { %3838 = vmatpush3.bf16.msra.mxu1 %v4570_v12 }
 0x18e   :  { %3840 = vmatprep.subr.bf16.mxu1 %v4574_v16 }
 0x190   :  { %3018 = vmatmul.mubr.f32.vlgmr.msra.gmra.mrb[2].mxu1 %v517_v6 }
 0x191   :  { %3842 = vmatpush3.bf16.msra.mxu1 %v4574_v16  ;;  %3052 = vmatprep.mubr.f32.mxu1 %v670_v9  ;;  %v960_v16 = vld [vmem:[#allocation3 + $0x228] sm:$0xff] }
 0x192   :  { %3844 = vmatprep.subr.bf16.mxu1 %v4578_v22 }
 0x195   :  { %3846 = vmatpush3.bf16.msra.mxu1 %v4578_v22  ;;  %v4749_v22 = vpack.c.bf16 %v962_v21, %v961_v19  ;;  %v938_v21 = vld [vmem:[#allocation3 + $0x190] sm:$0xff] }
 0x196   :  { %3848 = vmatprep.subr.bf16.mxu1 %v4582_v27 }
 0x199   :  { %3850 = vmatpush3.bf16.msra.mxu1 %v4582_v27  ;;  %v965_v27 = vld [vmem:[#allocation3 + $0x250] sm:$0xff] }
 0x19a   :  { %3852 = vmatprep.subr.bf16.mxu1 %v4586_v32  ;;  %v4757_v30 = vpack.c.bf16 %v966_v29, %v965_v27 }
 0x19d   :  { %3854 = vmatpush3.bf16.msra.mxu1 %v4586_v32  ;;  %v967_v32 = vld [vmem:[#allocation3 + $0x260] sm:$0xff] }
 0x19e   :  { %3856 = vmatprep.subr.bf16.mxu1 %v4590_v36  ;;  %v4761_v35 = vpack.c.bf16 %v968_v33, %v967_v32 }
 0x1a1   :  { %3858 = vmatpush3.bf16.msra.mxu1 %v4590_v36  ;;  %v969_v36 = vld [vmem:[#allocation3 + $0x270] sm:$0xff] }
 0x1a2   :  { %3860 = vmatprep.subr.bf16.mxu1 %v4594_v41  ;;  %v4765_v39 = vpack.c.bf16 %v970_v38, %v969_v36  ;;  %v4784_v36 = vpack.c.bf16 %v939_v23, %v938_v21  ;;  %v943_v38 = vld [vmem:[#allocation3 + $0x1b8] sm:$0xff]  ;;  %v1133_v21 = vld [vmem:[#allocation3 + $0x2c8] sm:$0xff] }
 0x1a5   :  { %3862 = vmatpush3.bf16.msra.mxu1 %v4594_v41  ;;  %v936_v41 = vld [vmem:[#allocation3 + $0x180] sm:$0xff] }
 0x1a6   :  { %3864 = vmatprep.subr.bf16.mxu1 %v4598_v45  ;;  %v4769_v44 = vpack.c.bf16 %v937_v42, %v936_v41 }
 0x1a9   :  { %3866 = vmatpush3.bf16.msra.mxu1 %v4598_v45 }
 0x1aa   :  { %3868 = vmatprep.subr.bf16.mxu1 %v4602_v50 }
 0x1ad   :  { %3870 = vmatpush3.bf16.msra.mxu1 %v4602_v50 }
 0x1b0   :  { %3053 = vmatmul.mubr.f32.vlgmr.msra.gmra.mrb[2].mxu1 %v671_v14 }
 0x221   :  { %v2914_v17 = vpop.f32.mrb[2].mxu0 }
 0x222   :  { %v414_v20 = vpop.f32.mrb[3].mxu0 }
 0x223   :  { %v4708_v31 = vadd.f32 %v2914_v17, %v414_v20  ;;  %v2949_v37 = vpop.f32.mrb[0].mxu1 }
 0x224   :  { %v499_v43 = vpop.f32.mrb[1].mxu1 }
 0x225   :  { %v4710_v49 = vadd.f32 %v2949_v37, %v499_v43  ;;  %v424_v45 = vrot.slane %v4708_v31, 4 }
 0x227   :  { %v425_v47 = vadd.f32 %v424_v45, %v4708_v31  ;;  %v509_v4 = vrot.slane %v4710_v49, 4  ;;  %v944_v45 = vld [vmem:[#allocation3 + $0x1c0] sm:$0xff] }
 0x229   :  { %v426_v51 = vrot.slane %v425_v47, 2  ;;  %v510_v6 = vadd.f32 %v509_v4, %v4710_v49  ;;  %v1126_v4 = vld [vmem:[#allocation3 + $0x290] sm:$0xff] }
 0x22b   :  { %v511_v17 = vrot.slane %v510_v6, 2 }
 0x22d   :  { %v512_v37 = vadd.f32 %v511_v17, %v510_v6  ;;  %v1127_v6 = vld [vmem:[#allocation3 + $0x298] sm:$0xff] }
 0x283   :  { %v3054_v56 = vpop.f32.mrb[2].mxu1 }
 0x284   :  { %v752_v60 = vmul.f32 0.1, %v3054_v56  ;;  %v738_v63 = vpop.f32.mrb[3].mxu1  ;;  %vm750_vm2 = vcmp.gt.f32.partialorder %v3054_v56, 0.0 }
 0x285   :  { %vm749_vm3 = vcmp.gt.f32.partialorder %v738_v63, 0.0  ;;  %v751_v3 = vmul.f32 0.1, %v738_v63 }
 0x286   :  { %v4715_v12 = vsel %vm750_vm2, %v3054_v56, %v752_v60  ;;  %v513_v60 = vrot.slane %v512_v37, 1 }
 0x287   :  { %v4712_v8 = vsel %vm749_vm3, %v738_v63, %v751_v3 }
 0x288   :  { %3087 = vmatprep.mubr.f32.mxu0 %v4712_v8  ;;  %v838_v13 = vmul.f32 %v4712_v8, %v4712_v8 }
 0x289   :  { %3088 = vmatmul.mubr.f32.vlgmr.msra.gmra.mrb[4].mxu0 %v4715_v12 }
 0x28a   :  { %3906 = vmatpush3.bf16.msra.mxu0 %v4504_v26  ;;  %3122 = vmatprep.mubr.f32.mxu0 %v838_v13  ;;  %v839_v26 = vmul.f32 %v4715_v12, %v4715_v12  ;;  %v514_v13 = vadd.f32 %v513_v60, %v512_v37  ;;  %v1235_v37 = vld [vmem:[#allocation3 + $0x500] sm:$0xff] }
 0x28b   :  { %3908 = vmatprep.subr.bf16.mxu0 %v4507_v28 }
 0x28e   :  { %3910 = vmatpush3.bf16.msra.mxu0 %v4507_v28  ;;  %v955_v28 = vld [vmem:[#allocation3 + $0x200] sm:$0xff] }
 0x28f   :  { %3912 = vmatprep.subr.bf16.mxu0 %v4515_v34 }
 0x292   :  { %3914 = vmatpush3.bf16.msra.mxu0 %v4515_v34  ;;  %v956_v34 = vld [vmem:[#allocation3 + $0x208] sm:$0xff] }
 0x293   :  { %3916 = vmatprep.subr.bf16.mxu0 %v4523_v40 }
 0x296   :  { %3918 = vmatpush3.bf16.msra.mxu0 %v4523_v40  ;;  %v4737_v40 = vpack.c.bf16 %v956_v34, %v955_v28 }
 0x297   :  { %3920 = vmatprep.subr.bf16.mxu0 %v4531_v46 }
 0x29a   :  { %3922 = vmatpush3.bf16.msra.mxu0 %v4531_v46  ;;  %v957_v46 = vld [vmem:[#allocation3 + $0x210] sm:$0xff] }
 0x29b   :  { %3924 = vmatprep.subr.bf16.mxu0 %v4539_v53 }
 0x29e   :  { %3926 = vmatpush3.bf16.msra.mxu0 %v4539_v53  ;;  %v958_v53 = vld [vmem:[#allocation3 + $0x218] sm:$0xff] }
 0x29f   :  { %3928 = vmatprep.subr.bf16.mxu0 %v4547_v59  ;;  %v4741_v15 = vpack.c.bf16 %v958_v53, %v957_v46 }
 0x2a2   :  { %3930 = vmatpush3.bf16.msra.mxu0 %v4547_v59  ;;  %v959_v59 = vld [vmem:[#allocation3 + $0x220] sm:$0xff] }
 0x2a3   :  { %3932 = vmatprep.subr.bf16.mxu0 %v4621_v55  ;;  %v4745_v18 = vpack.c.bf16 %v960_v16, %v959_v59 }
 0x2a6   :  { %3934 = vmatpush3.bf16.msra.mxu0 %v4621_v55  ;;  %v427_v55 = vadd.f32 %v426_v51, %v425_v47  ;;  %v945_v47 = vld [vmem:[#allocation3 + $0x1c8] sm:$0xff] }
 0x2a7   :  { %3936 = vmatprep.subr.bf16.mxu0 %v4737_v40  ;;  %v4804_v51 = vpack.c.bf16 %v945_v47, %v944_v45  ;;  %v1246_v45 = vld [vmem:[#allocation3 + $0x558] sm:$0xff]  ;;  %v1136_v47 = vld [vmem:[#allocation3 + $0x2e0] sm:$0xff] }
 0x2a8   :  { %v428_v61 = vrot.slane %v427_v55, 1 }
 0x2a9   :  { %3123 = vmatmul.mubr.f32.vlgmr.msra.gmra.mrb[6].mxu0 %v839_v26 }
 0x2aa   :  { %3938 = vmatpush3.bf16.msra.mxu0 %v4737_v40  ;;  %v429_v2 = vadd.f32 %v428_v61, %v427_v55 }
 0x2ab   :  { %3940 = vmatprep.subr.bf16.mxu0 %v4741_v15 }
 0x2ae   :  { %3942 = vmatpush3.bf16.msra.mxu0 %v4741_v15 }
 0x2af   :  { %3944 = vmatprep.subr.bf16.mxu0 %v4745_v18 }
 0x2b2   :  { %3946 = vmatpush3.bf16.msra.mxu0 %v4745_v18 }
 0x2b3   :  { %3948 = vmatprep.subr.bf16.mxu0 %v4749_v22 }
 0x2b6   :  { %3950 = vmatpush3.bf16.msra.mxu0 %v4749_v22 }
 0x2b7   :  { %3952 = vmatprep.subr.bf16.mxu0 %v4753_v25 }
 0x2ba   :  { %3954 = vmatpush3.bf16.msra.mxu0 %v4753_v25 }
 0x2bb   :  { %3956 = vmatprep.subr.bf16.mxu0 %v4757_v30 }
 0x2be   :  { %3958 = vmatpush3.bf16.msra.mxu0 %v4757_v30 }
 0x2bf   :  { %3960 = vmatprep.subr.bf16.mxu0 %v4761_v35 }
 0x2c2   :  { %3962 = vmatpush3.bf16.msra.mxu0 %v4761_v35 }
 0x2c3   :  { %3964 = vmatprep.subr.bf16.mxu0 %v4765_v39 }
 0x2c6   :  { %3966 = vmatpush3.bf16.msra.mxu0 %v4765_v39 }
 0x2c7   :  { %3968 = vmatprep.subr.bf16.mxu0 %v4769_v44 }
 0x35c   :  { %v3089_v48 = vpop.f32.mrb[4].mxu0 }
 0x35d   :  { %v821_v50 = vpop.f32.mrb[5].mxu0 }
 0x35e   :  { %v830_v52 = vadd.f32 %v3089_v48, %v821_v50 }
 0x360   :  { %v831_v54 = vrot.slane %v830_v52, 4 }
 0x362   :  { %v832_v57 = vadd.f32 %v831_v54, %v830_v52  ;;  %v946_v52 = vld [vmem:[#allocation3 + $0x1d0] sm:$0xff]  ;;  %v947_v54 = vld [vmem:[#allocation3 + $0x1d8] sm:$0xff] }
 0x363   :  { %v4808_v55 = vpack.c.bf16 %v947_v54, %v946_v52  ;;  %v1137_v52 = vld [vmem:[#allocation3 + $0x2e8] sm:$0xff] }
 0x364   :  { %v833_v58 = vrot.slane %v832_v57, 2 }
 0x366   :  { %v834_v62 = vadd.f32 %v833_v58, %v832_v57  ;;  %v948_v57 = vld [vmem:[#allocation3 + $0x1e0] sm:$0xff]  ;;  %v949_v58 = vld [vmem:[#allocation3 + $0x1e8] sm:$0xff] }
 0x367   :  { %v4812_v61 = vpack.c.bf16 %v949_v58, %v948_v57  ;;  %v4865_v57 = vpack.c.bf16 %v1137_v52, %v1136_v47  ;;  %v1138_v58 = vld [vmem:[#allocation3 + $0x2f0] sm:$0xff] }
 0x368   :  { %v835_v1 = vrot.slane %v834_v62, 1 }
 0x36a   :  { %v836_v10 = vadd.f32 %v835_v1, %v834_v62  ;;  %v951_v62 = vld [vmem:[#allocation3 + $0x1f8] sm:$0xff] }
 0x36c   :  { %v837_v11 = vadd.f32 %v836_v10, %v429_v2  ;;  %v1124_v2 = vld [vmem:[#allocation3 + $0x280] sm:$0xff]  ;;  %v1125_v10 = vld [vmem:[#allocation3 + $0x288] sm:$0xff] }
 0x36e   :  { %v923_v34 = vmul.f32 %v837_v11, %v837_v11  ;;  %v927_v49 = vsub.f32 %v4637_v7, %v837_v11  ;;  %v928_v59 = vsub.f32 %v4635_v5, %v837_v11  ;;  %v1631_v16 = vsub.f32 %v4712_v8, %v837_v11  ;;  %v940_v5 = vld [vmem:[#allocation3 + $0x1a0] sm:$0xff]  ;;  %v941_v7 = vld [vmem:[#allocation3 + $0x1a8] sm:$0xff] }
 0x36f   :  { %v1632_v19 = vsub.f32 %v4715_v12, %v837_v11  ;;  %v4790_v8 = vpack.c.bf16 %v941_v7, %v940_v5  ;;  %v942_v12 = vld [vmem:[#allocation3 + $0x1b0] sm:$0xff]  ;;  %v4820_v11 = vpack.c.bf16 %v1125_v10, %v1124_v2  ;;  %v1135_v7 = vld [vmem:[#allocation3 + $0x2d8] sm:$0xff] }
 0x370   :  { %v4794_v42 = vpack.c.bf16 %v943_v38, %v942_v12  ;;  %v1134_v5 = vld [vmem:[#allocation3 + $0x2d0] sm:$0xff]  ;;  %v1363_v10 = vld [vmem:[#allocation3 + $0x398] sm:$0xff] }
 0x371   :  { %v4857_v38 = vpack.c.bf16 %v1135_v7, %v1134_v5  ;;  %v1362_v2 = vld [vmem:[#allocation3 + $0x390] sm:$0xff]  ;;  %v1341_v5 = vld [vmem:[#allocation3 + $0x300] sm:$0xff] }
 0x37c   :  { %v3124_v9 = vpop.f32.mrb[6].mxu0 }
 0x37d   :  { %v906_v14 = vpop.f32.mrb[7].mxu0 }
 0x37e   :  { %v915_v20 = vadd.f32 %v3124_v9, %v906_v14  ;;  %v4824_v9 = vpack.c.bf16 %v1127_v6, %v1126_v4  ;;  %v1128_v14 = vld [vmem:[#allocation3 + $0x2a0] sm:$0xff]  ;;  %v4944_v6 = vpack.c.bf16 %v1363_v10, %v1362_v2  ;;  %v1351_v10 = vld [vmem:[#allocation3 + $0x350] sm:$0xff] }
 0x380   :  { %v916_v31 = vrot.slane %v915_v20, 4 }
 0x382   :  { %v917_v43 = vadd.f32 %v916_v31, %v915_v20  ;;  %v1129_v31 = vld [vmem:[#allocation3 + $0x2a8] sm:$0xff] }
 0x384   :  { %v918_v56 = vrot.slane %v917_v43, 2 }
 0x386   :  { %v919_v63 = vadd.f32 %v918_v56, %v917_v43  ;;  %v1236_v43 = vld [vmem:[#allocation3 + $0x508] sm:$0xff]  ;;  %v1237_v56 = vld [vmem:[#allocation3 + $0x510] sm:$0xff] }
 0x387   :  { %v4827_v60 = vpack.c.bf16 %v1236_v43, %v1235_v37  ;;  %v1368_v43 = vld [vmem:[#allocation3 + $0x3c0] sm:$0xff] }
 0x388   :  { %v920_v3 = vrot.slane %v919_v63, 1 }
 0x389   :  { %4032 = vmatprep.subr.bf16.mxu1 %v4827_v60 }
 0x38a   :  { %v921_v26 = vadd.f32 %v920_v3, %v919_v63  ;;  %v1238_v63 = vld [vmem:[#allocation3 + $0x518] sm:$0xff]  ;;  %v4830_v3 = vpack.c.bf16 %v1129_v31, %v1128_v14  ;;  %4034 = vmatpush3.bf16.msra.mxu1 %v4827_v60  ;;  %v1365_v14 = vld [vmem:[#allocation3 + $0x3a8] sm:$0xff] }
 0x38b   :  { %v1367_v31 = vld [vmem:[#allocation3 + $0x3b8] sm:$0xff] }
 0x38c   :  { %v922_v28 = vadd.f32 %v921_v26, %v514_v13  ;;  %v4832_v13 = vpack.c.bf16 %v1238_v63, %v1237_v56  ;;  %v1239_v26 = vld [vmem:[#allocation3 + $0x520] sm:$0xff]  ;;  %v1369_v56 = vld [vmem:[#allocation3 + $0x3c8] sm:$0xff] }
 0x38d   :  { %v4956_v63 = vpack.c.bf16 %v1369_v56, %v1368_v43  ;;  %v1529_v56 = vld [vmem:[#allocation3 + $0x400] sm:$0xff] }
 0x38e   :  { %v924_v46 = vsub.f32 %v922_v28, %v923_v34  ;;  %v1240_v28 = vld [vmem:[#allocation3 + $0x528] sm:$0xff]  ;;  %v1130_v34 = vld [vmem:[#allocation3 + $0x2b0] sm:$0xff]  ;;  %4036 = vmatprep.subr.bf16.mxu1 %v4832_v13 }
 0x38f   :  { %4038 = vmatpush3.bf16.msra.mxu1 %v4832_v13 }
 0x390   :  { %v925_v53 = vadd.f32 1e-05, %v924_v46  ;;  %v1131_v46 = vld [vmem:[#allocation3 + $0x2b8] sm:$0xff] }
 0x392   :  { %4411 = vrsqrt.f32 %v925_v53  ;;  %v4838_v53 = vpack.c.bf16 %v1240_v28, %v1239_v26  ;;  %v1371_v26 = vld [vmem:[#allocation3 + $0x3d8] sm:$0xff] }
 0x394   :  { %4040 = vmatprep.subr.bf16.mxu1 %v4838_v53 }
 0x395   :  { %4042 = vmatpush3.bf16.msra.mxu1 %v4838_v53 }
 0x39c   :  { %v4412_v24 = vpop.eup %4411 }
 0x39d   :  { %v929_v27 = vmul.f32 %v4412_v24, %v927_v49  ;;  %v930_v29 = vmul.f32 %v4412_v24, %v928_v59  ;;  %v4780_v32 = vmul.f32 %v4412_v24, %v1631_v16  ;;  %v4782_v33 = vmul.f32 %v4412_v24, %v1632_v19  ;;  %v1241_v59 = vld [vmem:[#allocation3 + $0x530] sm:$0xff]  ;;  %v1242_v16 = vld [vmem:[#allocation3 + $0x538] sm:$0xff]  ;;  %v1132_v19 = vld [vmem:[#allocation3 + $0x2c0] sm:$0xff] }
 0x39e   :  { %v4841_v49 = vpack.c.bf16 %v1131_v46, %v1130_v34  ;;  %v4846_v23 = vpack.c.bf16 %v1242_v16, %v1241_v59  ;;  %v4849_v24 = vpack.c.bf16 %v1133_v21, %v1132_v19  ;;  %v1372_v34 = vld [vmem:[#allocation3 + $0x3e0] sm:$0xff]  ;;  %v1373_v46 = vld [vmem:[#allocation3 + $0x3e8] sm:$0xff] }
 0x39f   :  { %931 = vst [vmem:[#allocation2 + $0x1] sm:$0xff] %v929_v27  ;;  %932 = vst [vmem:[#allocation2 + $0x9] sm:$0xff] %v930_v29  ;;  %3157 = vmatprep.mubr.f32.mxu0 %v929_v27  ;;  %v1243_v27 = vld [vmem:[#allocation3 + $0x540] sm:$0xff]  ;;  %v4965_v59 = vpack.c.bf16 %v1373_v46, %v1372_v34  ;;  %v1531_v34 = vld [vmem:[#allocation3 + $0x410] sm:$0xff] }
 0x3a0   :  { %1635 = vst [vmem:[#allocation2 + $0x19] sm:$0xff] %v4780_v32  ;;  %1636 = vst [vmem:[#allocation2 + $0x21] sm:$0xff] %v4782_v33  ;;  %3158 = vmatmul.mubr.f32.vlgmr.msra.gmra.mrb[8].mxu0 %v930_v29  ;;  %v1244_v29 = vld [vmem:[#allocation3 + $0x548] sm:$0xff]  ;;  %4044 = vmatprep.subr.bf16.mxu1 %v4846_v23  ;;  %v1532_v46 = vld [vmem:[#allocation3 + $0x418] sm:$0xff] }
 0x3a1   :  { %3970 = vmatpush3.bf16.msra.mxu0 %v4769_v44  ;;  %v4854_v12 = vpack.c.bf16 %v1244_v29, %v1243_v27  ;;  %4046 = vmatpush3.bf16.msra.mxu1 %v4846_v23  ;;  %v1374_v27 = vld [vmem:[#allocation3 + $0x3f0] sm:$0xff]  ;;  %v1375_v29 = vld [vmem:[#allocation3 + $0x3f8] sm:$0xff] }
 0x3a2   :  { %3972 = vmatprep.subr.bf16.mxu0 %v4784_v36 }
 0x3a3   :  { %4048 = vmatprep.subr.bf16.mxu1 %v4854_v12 }
 0x3a5   :  { %3974 = vmatpush3.bf16.msra.mxu0 %v4784_v36  ;;  %4050 = vmatpush3.bf16.msra.mxu1 %v4854_v12 }
 0x3a6   :  { %v933_v41 = vld [vmem:[#allocation2] sm:$0xff]  ;;  %3976 = vmatprep.subr.bf16.mxu0 %v4790_v8  ;;  %v4796_v48 = vld [vmem:[#allocation2 + $0xa] sm:$0xff] }
 0x3a7   :  { %3192 = vmatprep.mubr.f32.mxu0 %v933_v41  ;;  %1337 = vst [vmem:[#allocation2 + $0x10] sm:$0x1] %v4440_v0  ;;  %v4799_v50 = vld [vmem:[#allocation2 + $0x22] sm:$0xff] }
 0x3a8   :  { %2036 = vst [vmem:[#allocation2 + $0x28] sm:$0x1] %v4440_v0  ;;  %v950_v0 = vld [vmem:[#allocation3 + $0x1f0] sm:$0xff]  ;;  %v934_v17 = vld [vmem:[#allocation2 + $0x8] sm:$0xff] }
 0x3a9   :  { %3978 = vmatpush3.bf16.msra.mxu0 %v4790_v8  ;;  %v4816_v1 = vpack.c.bf16 %v951_v62, %v950_v0  ;;  %v1121_v20 = vld [vmem:[#allocation2 + $0x2] sm:$0xff] }
 0x3aa   :  { %3980 = vmatprep.subr.bf16.mxu0 %v4794_v42  ;;  %v1245_v41 = vld [vmem:[#allocation3 + $0x550] sm:$0xff]  ;;  %v1139_v0 = vld [vmem:[#allocation3 + $0x2f8] sm:$0xff] }
 0x3ab   :  { %v4862_v54 = vpack.c.bf16 %v1246_v45, %v1245_v41  ;;  %v4871_v62 = vpack.c.bf16 %v1139_v0, %v1138_v58  ;;  %v1342_v41 = vld [vmem:[#allocation3 + $0x308] sm:$0xff]  ;;  %v4987_v58 = vld [vmem:[%s5140_s2 + $0x2] ss:$0 sm:$0xff] }
 0x3ac   :  { %v4974_v45 = vpack.c.bf16 %v1342_v41, %v1341_v5  ;;  %v1536_v41 = vld [vmem:[#allocation3 + $0x438] sm:$0xff] }
 0x3ad   :  { %3982 = vmatpush3.bf16.msra.mxu0 %v4794_v42  ;;  %4052 = vmatprep.subr.bf16.mxu1 %v4862_v54 }
 0x3ae   :  { %3984 = vmatprep.subr.bf16.mxu0 %v4804_v51  ;;  %4054 = vmatpush3.bf16.msra.mxu1 %v4862_v54 }
 0x3b1   :  { %3986 = vmatpush3.bf16.msra.mxu0 %v4804_v51 }
 0x3b2   :  { %3988 = vmatprep.subr.bf16.mxu0 %v4808_v55 }
 0x3b5   :  { %3990 = vmatpush3.bf16.msra.mxu0 %v4808_v55 }
 0x3b6   :  { %3992 = vmatprep.subr.bf16.mxu0 %v4812_v61 }
 0x3b9   :  { %3994 = vmatpush3.bf16.msra.mxu0 %v4812_v61 }
 0x3ba   :  { %3996 = vmatprep.subr.bf16.mxu0 %v4816_v1 }
 0x3bd   :  { %3998 = vmatpush3.bf16.msra.mxu0 %v4816_v1 }
 0x3be   :  { %4000 = vmatprep.subr.bf16.mxu0 %v4820_v11 }
 0x3c0   :  { %3193 = vmatmul.mubr.f32.vlgmr.msra.gmra.mrb[8].mxu0 %v934_v17 }
 0x3c1   :  { %4002 = vmatpush3.bf16.msra.mxu0 %v4820_v11  ;;  %3227 = vmatprep.mubr.f32.mxu0 %v1121_v20  ;;  %v1366_v20 = vld [vmem:[#allocation3 + $0x3b0] sm:$0xff] }
 0x3c2   :  { %4004 = vmatprep.subr.bf16.mxu0 %v4824_v9  ;;  %v4952_v37 = vpack.c.bf16 %v1367_v31, %v1366_v20  ;;  %v1355_v20 = vld [vmem:[#allocation3 + $0x370] sm:$0xff]  ;;  %v1356_v31 = vld [vmem:[#allocation3 + $0x378] sm:$0xff] }
 0x3c3   :  { %v5015_v43 = vpack.c.bf16 %v1356_v31, %v1355_v20 }
 0x3c5   :  { %4006 = vmatpush3.bf16.msra.mxu0 %v4824_v9 }
 0x3c6   :  { %4008 = vmatprep.subr.bf16.mxu0 %v4830_v3 }
 0x3c9   :  { %4010 = vmatpush3.bf16.msra.mxu0 %v4830_v3 }
 0x3ca   :  { %4012 = vmatprep.subr.bf16.mxu0 %v4841_v49 }
 0x3cd   :  { %4014 = vmatpush3.bf16.msra.mxu0 %v4841_v49 }
 0x3ce   :  { %4016 = vmatprep.subr.bf16.mxu0 %v4849_v24 }
 0x3d1   :  { %4018 = vmatpush3.bf16.msra.mxu0 %v4849_v24 }
 0x3d2   :  { %4020 = vmatprep.subr.bf16.mxu0 %v4857_v38 }
 0x3d5   :  { %4022 = vmatpush3.bf16.msra.mxu0 %v4857_v38 }
 0x3d6   :  { %4024 = vmatprep.subr.bf16.mxu0 %v4865_v57 }
 0x3d9   :  { %4026 = vmatpush3.bf16.msra.mxu0 %v4865_v57 }
 0x3da   :  { %4028 = vmatprep.subr.bf16.mxu0 %v4871_v62 }
 0x3dd   :  { %4030 = vmatpush3.bf16.msra.mxu0 %v4871_v62 }
 0x3de   :  { %4160 = vmatprep.subr.bf16.mxu0 %v4737_v40 }
 0x3e0   :  { %3228 = vmatmul.mubr.f32.vlgmr.msra.gmra.mrb[8].mxu0 %v4796_v48 }
 0x3e1   :  { %4162 = vmatpush3.bf16.msra.mxu0 %v4737_v40  ;;  %3402 = vmatprep.mubr.f32.mxu0 %v4780_v32  ;;  %v1637_v40 = vld [vmem:[#allocation2 + $0x18] sm:$0xff]  ;;  %v1360_v32 = vld [vmem:[#allocation3 + $0x380] sm:$0xff] }
 0x3e2   :  { %4164 = vmatprep.subr.bf16.mxu0 %v4741_v15 }
 0x3e5   :  { %4166 = vmatpush3.bf16.msra.mxu0 %v4741_v15  ;;  %v1638_v15 = vld [vmem:[#allocation2 + $0x20] sm:$0xff] }
 0x3e6   :  { %4168 = vmatprep.subr.bf16.mxu0 %v4745_v18 }
 0x3e9   :  { %4170 = vmatpush3.bf16.msra.mxu0 %v4745_v18  ;;  %v1823_v18 = vld [vmem:[#allocation2 + $0x1a] sm:$0xff] }
 0x3ea   :  { %4172 = vmatprep.subr.bf16.mxu0 %v4749_v22 }
 0x3ed   :  { %4174 = vmatpush3.bf16.msra.mxu0 %v4749_v22  ;;  %v1247_v22 = vld [vmem:[#allocation3 + $0x560] sm:$0xff] }
 0x3ee   :  { %4176 = vmatprep.subr.bf16.mxu0 %v4753_v25 }
 0x3f1   :  { %4178 = vmatpush3.bf16.msra.mxu0 %v4753_v25  ;;  %v1248_v25 = vld [vmem:[#allocation3 + $0x568] sm:$0xff] }
 0x3f2   :  { %4180 = vmatprep.subr.bf16.mxu0 %v4757_v30 }
 0x3f5   :  { %4182 = vmatpush3.bf16.msra.mxu0 %v4757_v30  ;;  %v4923_v30 = vpack.c.bf16 %v1248_v25, %v1247_v22  ;;  %v1343_v22 = vld [vmem:[#allocation3 + $0x310] sm:$0xff]  ;;  %v1344_v25 = vld [vmem:[#allocation3 + $0x318] sm:$0xff] }
 0x3f6   :  { %4184 = vmatprep.subr.bf16.mxu0 %v4761_v35 }
 0x3f7   :  { %4056 = vmatprep.subr.bf16.mxu1 %v4923_v30 }
 0x3f8   :  { %4058 = vmatpush3.bf16.msra.mxu1 %v4923_v30 }
 0x3f9   :  { %4186 = vmatpush3.bf16.msra.mxu0 %v4761_v35  ;;  %v1249_v35 = vld [vmem:[#allocation3 + $0x570] sm:$0xff] }
 0x3fa   :  { %4188 = vmatprep.subr.bf16.mxu0 %v4765_v39 }
 0x3fd   :  { %4190 = vmatpush3.bf16.msra.mxu0 %v4765_v39  ;;  %v1250_v39 = vld [vmem:[#allocation3 + $0x578] sm:$0xff] }
 0x3fe   :  { %4192 = vmatprep.subr.bf16.mxu0 %v4769_v44 }
 0x400   :  { %3403 = vmatmul.mubr.f32.vlgmr.msra.gmra.mrb[10].mxu0 %v4782_v33  ;;  %v1361_v33 = vld [vmem:[#allocation3 + $0x388] sm:$0xff] }
 0x401   :  { %4194 = vmatpush3.bf16.msra.mxu0 %v4769_v44  ;;  %3437 = vmatprep.mubr.f32.mxu0 %v1637_v40  ;;  %v4929_v44 = vpack.c.bf16 %v1250_v39, %v1249_v35  ;;  %v4991_v35 = vpack.c.bf16 %v1344_v25, %v1343_v22  ;;  %v1541_v22 = vld [vmem:[#allocation3 + $0x460] sm:$0xff]  ;;  %v1542_v25 = vld [vmem:[#allocation3 + $0x468] sm:$0xff] }
 0x402   :  { %4196 = vmatprep.subr.bf16.mxu0 %v4784_v36 }
 0x403   :  { %4060 = vmatprep.subr.bf16.mxu1 %v4929_v44 }
 0x404   :  { %4062 = vmatpush3.bf16.msra.mxu1 %v4929_v44 }
 0x405   :  { %4198 = vmatpush3.bf16.msra.mxu0 %v4784_v36  ;;  %v4937_v36 = vpack.c.bf16 %v1361_v33, %v1360_v32  ;;  %v1345_v32 = vld [vmem:[#allocation3 + $0x320] sm:$0xff]  ;;  %v1346_v33 = vld [vmem:[#allocation3 + $0x328] sm:$0xff] }
 0x406   :  { %4200 = vmatprep.subr.bf16.mxu0 %v4790_v8 }
 0x407   :  { %4064 = vmatprep.subr.bf16.mxu1 %v4937_v36 }
 0x409   :  { %4202 = vmatpush3.bf16.msra.mxu0 %v4790_v8  ;;  %v2335_v8 = vld [vmem:[%s5140_s2] ss:$0 sm:$0xff] }
 0x40a   :  { %4204 = vmatprep.subr.bf16.mxu0 %v4794_v42 }
 0x40d   :  { %4206 = vmatpush3.bf16.msra.mxu0 %v4794_v42 }
 0x40e   :  { %4208 = vmatprep.subr.bf16.mxu0 %v4804_v51 }
 0x411   :  { %4210 = vmatpush3.bf16.msra.mxu0 %v4804_v51 }
 0x412   :  { %4212 = vmatprep.subr.bf16.mxu0 %v4808_v55 }
 0x415   :  { %4214 = vmatpush3.bf16.msra.mxu0 %v4808_v55 }
 0x416   :  { %4216 = vmatprep.subr.bf16.mxu0 %v4812_v61 }
 0x419   :  { %4218 = vmatpush3.bf16.msra.mxu0 %v4812_v61 }
 0x41a   :  { %4220 = vmatprep.subr.bf16.mxu0 %v4816_v1 }
 0x41d   :  { %4222 = vmatpush3.bf16.msra.mxu0 %v4816_v1 }
 0x41e   :  { %4224 = vmatprep.subr.bf16.mxu0 %v4820_v11 }
 0x420   :  { %3438 = vmatmul.mubr.f32.vlgmr.msra.gmra.mrb[10].mxu0 %v1638_v15 }
 0x421   :  { %4226 = vmatpush3.bf16.msra.mxu0 %v4820_v11  ;;  %3472 = vmatprep.mubr.f32.mxu0 %v1823_v18 }
 0x422   :  { %4228 = vmatprep.subr.bf16.mxu0 %v4824_v9 }
 0x425   :  { %4230 = vmatpush3.bf16.msra.mxu0 %v4824_v9  ;;  %v1364_v9 = vld [vmem:[#allocation3 + $0x3a0] sm:$0xff] }
 0x426   :  { %4232 = vmatprep.subr.bf16.mxu0 %v4830_v3  ;;  %v4948_v17 = vpack.c.bf16 %v1365_v14, %v1364_v9  ;;  %v1354_v9 = vld [vmem:[#allocation3 + $0x368] sm:$0xff] }
 0x429   :  { %4234 = vmatpush3.bf16.msra.mxu0 %v4830_v3  ;;  %v1370_v3 = vld [vmem:[#allocation3 + $0x3d0] sm:$0xff] }
 0x42a   :  { %4236 = vmatprep.subr.bf16.mxu0 %v4841_v49  ;;  %v4961_v28 = vpack.c.bf16 %v1371_v26, %v1370_v3  ;;  %v1530_v3 = vld [vmem:[#allocation3 + $0x408] sm:$0xff] }
 0x42b   :  { %v5019_v26 = vpack.c.bf16 %v1530_v3, %v1529_v56 }
 0x42d   :  { %4238 = vmatpush3.bf16.msra.mxu0 %v4841_v49 }
 0x42e   :  { %4240 = vmatprep.subr.bf16.mxu0 %v4849_v24 }
 0x431   :  { %4242 = vmatpush3.bf16.msra.mxu0 %v4849_v24 }
 0x432   :  { %4244 = vmatprep.subr.bf16.mxu0 %v4857_v38 }
 0x435   :  { %4246 = vmatpush3.bf16.msra.mxu0 %v4857_v38  ;;  %v4972_v38 = vpack.c.bf16 %v1375_v29, %v1374_v27  ;;  %v1534_v27 = vld [vmem:[#allocation3 + $0x428] sm:$0xff] }
 0x436   :  { %4248 = vmatprep.subr.bf16.mxu0 %v4865_v57 }
 0x439   :  { %4250 = vmatpush3.bf16.msra.mxu0 %v4865_v57 }
 0x43a   :  { %4252 = vmatprep.subr.bf16.mxu0 %v4871_v62 }
 0x43d   :  { %4254 = vmatpush3.bf16.msra.mxu0 %v4871_v62 }
 0x440   :  { %3473 = vmatmul.mubr.f32.vlgmr.msra.gmra.mrb[10].mxu0 %v4799_v50 }
 0x4b3   :  { %v3229_v42 = vpop.f32.mrb[8].mxu0 }
 0x4b4   :  { %v1223_v48 = vadd.f32 %v3229_v42, %v2335_v8  ;;  %v1206_v51 = vpop.f32.mrb[9].mxu0  ;;  %v4995_v42 = vpack.c.bf16 %v1346_v33, %v1345_v32  ;;  %v1543_v32 = vld [vmem:[#allocation3 + $0x470] sm:$0xff]  ;;  %v1544_v33 = vld [vmem:[#allocation3 + $0x478] sm:$0xff] }
 0x4b5   :  { %v1222_v55 = vadd.f32 %v2335_v8, %v1206_v51  ;;  %v1348_v51 = vld [vmem:[#allocation3 + $0x338] sm:$0xff] }
 0x4b6   :  { %v1228_v61 = vrot.slane %v1223_v48, 1 }
 0x4b7   :  { %v1227_v1 = vrot.slane %v1222_v55, 1 }
 0x4b8   :  { %v1233_v4 = vmax.f32 %v1223_v48, %v1228_v61  ;;  %v1347_v48 = vld [vmem:[#allocation3 + $0x330] sm:$0xff] }
 0x4b9   :  { %v1229_v50 = vsel %vm1226_vm4, %v1227_v1, %v1228_v61  ;;  %v1349_v61 = vld [vmem:[#allocation3 + $0x340] sm:$0xff]  ;;  %v1350_v1 = vld [vmem:[#allocation3 + $0x348] sm:$0xff] }
 0x4ba   :  { %v1232_v11 = vmax.f32 %v1222_v55, %v1229_v50  ;;  %v4999_v55 = vpack.c.bf16 %v1348_v51, %v1347_v48  ;;  %v5003_v2 = vpack.c.bf16 %v1350_v1, %v1349_v61  ;;  %v1352_v50 = vld [vmem:[#allocation3 + $0x358] sm:$0xff] }
 0x4bc   :  { %3262 = vmatprep.mubr.f32.mxu1 %v1232_v11 }
 0x4bd   :  { %3263 = vmatmul.mubr.f32.vlgmr.msra.gmra.mrb[4].mxu1 %v1233_v4 }
 0x4be   :  { %4066 = vmatpush3.bf16.msra.mxu1 %v4937_v36 }
 0x4bf   :  { %4068 = vmatprep.subr.bf16.mxu1 %v4944_v6 }
 0x4c2   :  { %4070 = vmatpush3.bf16.msra.mxu1 %v4944_v6 }
 0x4c3   :  { %4072 = vmatprep.subr.bf16.mxu1 %v4948_v17 }
 0x4c6   :  { %4074 = vmatpush3.bf16.msra.mxu1 %v4948_v17 }
 0x4c7   :  { %4076 = vmatprep.subr.bf16.mxu1 %v4952_v37 }
 0x4ca   :  { %4078 = vmatpush3.bf16.msra.mxu1 %v4952_v37 }
 0x4cb   :  { %4080 = vmatprep.subr.bf16.mxu1 %v4956_v63 }
 0x4ce   :  { %4082 = vmatpush3.bf16.msra.mxu1 %v4956_v63 }
 0x4cf   :  { %4084 = vmatprep.subr.bf16.mxu1 %v4961_v28 }
 0x4d2   :  { %4086 = vmatpush3.bf16.msra.mxu1 %v4961_v28 }
 0x4d3   :  { %4088 = vmatprep.subr.bf16.mxu1 %v4965_v59 }
 0x4d6   :  { %4090 = vmatpush3.bf16.msra.mxu1 %v4965_v59 }
 0x4d7   :  { %4092 = vmatprep.subr.bf16.mxu1 %v4972_v38 }
 0x4da   :  { %4094 = vmatpush3.bf16.msra.mxu1 %v4972_v38 }
 0x4db   :  { %4096 = vmatprep.subr.bf16.mxu1 %v4974_v45 }
 0x513   :  { %v3474_v49 = vpop.f32.mrb[10].mxu0 }
 0x514   :  { %v4967_v16 = vadd.f32 %v3474_v49, %v2335_v8  ;;  %v1907_v19 = vpop.f32.mrb[11].mxu0  ;;  %v5023_v49 = vpack.c.bf16 %v1532_v46, %v1531_v34 }
 0x515   :  { %v1923_v21 = vadd.f32 %v2335_v8, %v1907_v19 }
 0x516   :  { %v1928_v24 = vrot.slane %v4967_v16, 1 }
 0x517   :  { %v1927_v7 = vrot.slane %v1923_v21, 1 }
 0x519   :  { %v1929_v47 = vsel %vm1226_vm4, %v1927_v7, %v1928_v24  ;;  %v1535_v7 = vld [vmem:[#allocation3 + $0x430] sm:$0xff] }
 0x51a   :  { %v4980_v52 = vmax.f32 %v1923_v21, %v1929_v47  ;;  %v1533_v21 = vld [vmem:[#allocation3 + $0x420] sm:$0xff]  ;;  %v5031_v47 = vpack.c.bf16 %v1536_v41, %v1535_v7 }
 0x51b   :  { %v5027_v5 = vpack.c.bf16 %v1534_v27, %v1533_v21 }
 0x590   :  { %v3264_v57 = vpop.f32.mrb[4].mxu1 }
 0x591   :  { %v1327_v0 = vmax.f32 %v1233_v4, %v3264_v57  ;;  %v1317_v62 = vpop.f32.mrb[5].mxu1  ;;  %v1353_v4 = vld [vmem:[#allocation3 + $0x360] sm:$0xff] }
 0x592   :  { %v1326_v40 = vmax.f32 %v1232_v11, %v1317_v62  ;;  %v5007_v11 = vpack.c.bf16 %v1352_v50, %v1351_v10  ;;  %v5011_v14 = vpack.c.bf16 %v1354_v9, %v1353_v4  ;;  %v1537_v57 = vld [vmem:[#allocation3 + $0x440] sm:$0xff] }
 0x593   :  { %v1334_v15 = vmul.f32 %v4987_v58, %v1327_v0  ;;  %v1538_v0 = vld [vmem:[#allocation3 + $0x448] sm:$0xff] }
 0x594   :  { %v1333_v18 = vmul.f32 %v4987_v58, %v1326_v40  ;;  %v5035_v62 = vpack.c.bf16 %v1538_v0, %v1537_v57  ;;  %v1539_v40 = vld [vmem:[#allocation3 + $0x450] sm:$0xff] }
 0x595   :  { %1336 = vst [vmem:[#allocation2 + $0x9] sm:$0x7f] %v1334_v15  ;;  %v1540_v15 = vld [vmem:[#allocation3 + $0x458] sm:$0xff] }
 0x596   :  { %1335 = vst [vmem:[#allocation2 + $0x1] sm:$0xff] %v1333_v18  ;;  %3297 = vmatprep.mubr.f32.mxu1 %v1333_v18  ;;  %v5039_v18 = vpack.c.bf16 %v1540_v15, %v1539_v40 }
 0x59c   :  { %v1358_v39 = vld [vmem:[#allocation2 + $0x9] sm:$0xff] }
 0x59d   :  { %3298 = vmatmul.mubr.f32.vlgmr.msra.gmra.mrb[6].mxu1 %v1358_v39  ;;  %v1338_v8 = vld [vmem:[#allocation2] sm:$0xff]  ;;  %v1339_v19 = vld [vmem:[#allocation2 + $0x8] sm:$0xff]  ;;  %v5043_v39 = vpack.c.bf16 %v1542_v25, %v1541_v22 }
 0x59e   :  { %4098 = vmatpush3.bf16.msra.mxu1 %v4974_v45  ;;  %3332 = vmatprep.mubr.f32.mxu1 %v1338_v8  ;;  %v1526_v29 = vld [vmem:[#allocation2 + $0x2] sm:$0xff]  ;;  %v5047_v8 = vpack.c.bf16 %v1544_v33, %v1543_v32  ;;  %v1527_v48 = vld [vmem:[#allocation2 + $0xa] sm:$0xff] }
 0x59f   :  { %4100 = vmatprep.subr.bf16.mxu1 %v4991_v35 }
 0x5a2   :  { %4102 = vmatpush3.bf16.msra.mxu1 %v4991_v35 }
 0x5a3   :  { %4104 = vmatprep.subr.bf16.mxu1 %v4995_v42 }
 0x5a6   :  { %4106 = vmatpush3.bf16.msra.mxu1 %v4995_v42 }
 0x5a7   :  { %4108 = vmatprep.subr.bf16.mxu1 %v4999_v55 }
 0x5aa   :  { %4110 = vmatpush3.bf16.msra.mxu1 %v4999_v55 }
 0x5ab   :  { %4112 = vmatprep.subr.bf16.mxu1 %v5003_v2 }
 0x5ae   :  { %4114 = vmatpush3.bf16.msra.mxu1 %v5003_v2 }
 0x5af   :  { %4116 = vmatprep.subr.bf16.mxu1 %v5007_v11 }
 0x5b2   :  { %4118 = vmatpush3.bf16.msra.mxu1 %v5007_v11 }
 0x5b3   :  { %4120 = vmatprep.subr.bf16.mxu1 %v5011_v14 }
 0x5b6   :  { %4122 = vmatpush3.bf16.msra.mxu1 %v5011_v14 }
 0x5b7   :  { %4124 = vmatprep.subr.bf16.mxu1 %v5015_v43 }
 0x5ba   :  { %4126 = vmatpush3.bf16.msra.mxu1 %v5015_v43 }
 0x5bb   :  { %4128 = vmatprep.subr.bf16.mxu1 %v5019_v26 }
 0x5bd   :  { %3333 = vmatmul.mubr.f32.vlgmr.msra.gmra.mrb[6].mxu1 %v1339_v19 }
 0x5be   :  { %4130 = vmatpush3.bf16.msra.mxu1 %v5019_v26  ;;  %3367 = vmatprep.mubr.f32.mxu1 %v1526_v29 }
 0x5bf   :  { %4132 = vmatprep.subr.bf16.mxu1 %v5023_v49 }
 0x5c2   :  { %4134 = vmatpush3.bf16.msra.mxu1 %v5023_v49 }
 0x5c3   :  { %4136 = vmatprep.subr.bf16.mxu1 %v5027_v5 }
 0x5c6   :  { %4138 = vmatpush3.bf16.msra.mxu1 %v5027_v5 }
 0x5c7   :  { %4140 = vmatprep.subr.bf16.mxu1 %v5031_v47 }
 0x5ca   :  { %4142 = vmatpush3.bf16.msra.mxu1 %v5031_v47 }
 0x5cb   :  { %4144 = vmatprep.subr.bf16.mxu1 %v5035_v62 }
 0x5ce   :  { %4146 = vmatpush3.bf16.msra.mxu1 %v5035_v62 }
 0x5cf   :  { %4148 = vmatprep.subr.bf16.mxu1 %v5039_v18 }
 0x5d2   :  { %4150 = vmatpush3.bf16.msra.mxu1 %v5039_v18 }
 0x5d3   :  { %4152 = vmatprep.subr.bf16.mxu1 %v5043_v39 }
 0x5d6   :  { %4154 = vmatpush3.bf16.msra.mxu1 %v5043_v39 }
 0x5d7   :  { %4156 = vmatprep.subr.bf16.mxu1 %v5047_v8 }
 0x5da   :  { %4158 = vmatpush3.bf16.msra.mxu1 %v5047_v8 }
 0x5db   :  { %4256 = vmatprep.subr.bf16.mxu1 %v4827_v60 }
 0x5dd   :  { %3368 = vmatmul.mubr.f32.vlgmr.msra.gmra.mrb[6].mxu1 %v1527_v48 }
 0x5de   :  { %4258 = vmatpush3.bf16.msra.mxu1 %v4827_v60  ;;  %3507 = vmatprep.mubr.f32.mxu1 %v4980_v52  ;;  %v1933_v60 = vmax.f32 %v4967_v16, %v1928_v24 }
 0x5df   :  { %4260 = vmatprep.subr.bf16.mxu1 %v4832_v13 }
 0x5e2   :  { %4262 = vmatpush3.bf16.msra.mxu1 %v4832_v13  ;;  %v2337_v13 = vld [vmem:[%s5140_s2 + $0x1] ss:$0 sm:$0xff] }
 0x5e3   :  { %4264 = vmatprep.subr.bf16.mxu1 %v4838_v53 }
 0x5e6   :  { %4266 = vmatpush3.bf16.msra.mxu1 %v4838_v53 }
 0x5e7   :  { %4268 = vmatprep.subr.bf16.mxu1 %v4846_v23 }
 0x5ea   :  { %4270 = vmatpush3.bf16.msra.mxu1 %v4846_v23 }
 0x5eb   :  { %4272 = vmatprep.subr.bf16.mxu1 %v4854_v12 }
 0x5ee   :  { %4274 = vmatpush3.bf16.msra.mxu1 %v4854_v12 }
 0x5ef   :  { %4276 = vmatprep.subr.bf16.mxu1 %v4862_v54 }
 0x5f2   :  { %4278 = vmatpush3.bf16.msra.mxu1 %v4862_v54 }
 0x5f3   :  { %4280 = vmatprep.subr.bf16.mxu1 %v4923_v30 }
 0x5f6   :  { %4282 = vmatpush3.bf16.msra.mxu1 %v4923_v30 }
 0x5f7   :  { %4284 = vmatprep.subr.bf16.mxu1 %v4929_v44 }
 0x5fa   :  { %4286 = vmatpush3.bf16.msra.mxu1 %v4929_v44 }
 0x5fb   :  { %4288 = vmatprep.subr.bf16.mxu1 %v4937_v36 }
 0x5fd   :  { %3508 = vmatmul.mubr.f32.vlgmr.msra.gmra.mrb[8].mxu1 %v1933_v60 }
 0x5fe   :  { %4290 = vmatpush3.bf16.msra.mxu1 %v4937_v36 }
 0x5ff   :  { %4292 = vmatprep.subr.bf16.mxu1 %v4944_v6 }
 0x602   :  { %4294 = vmatpush3.bf16.msra.mxu1 %v4944_v6 }
 0x603   :  { %4296 = vmatprep.subr.bf16.mxu1 %v4948_v17 }
 0x606   :  { %4298 = vmatpush3.bf16.msra.mxu1 %v4948_v17 }
 0x607   :  { %4300 = vmatprep.subr.bf16.mxu1 %v4952_v37 }
 0x60a   :  { %4302 = vmatpush3.bf16.msra.mxu1 %v4952_v37 }
 0x60b   :  { %4304 = vmatprep.subr.bf16.mxu1 %v4956_v63 }
 0x60e   :  { %4306 = vmatpush3.bf16.msra.mxu1 %v4956_v63 }
 0x60f   :  { %4308 = vmatprep.subr.bf16.mxu1 %v4961_v28 }
 0x612   :  { %4310 = vmatpush3.bf16.msra.mxu1 %v4961_v28 }
 0x613   :  { %4312 = vmatprep.subr.bf16.mxu1 %v4965_v59 }
 0x616   :  { %4314 = vmatpush3.bf16.msra.mxu1 %v4965_v59 }
 0x617   :  { %4316 = vmatprep.subr.bf16.mxu1 %v4972_v38 }
 0x61a   :  { %4318 = vmatpush3.bf16.msra.mxu1 %v4972_v38 }
 0x61b   :  { %4320 = vmatprep.subr.bf16.mxu1 %v4974_v45 }
 0x6b0   :  { %v3369_v53 = vpop.f32.mrb[6].mxu1 }
 0x6b1   :  { %v1628_v23 = vadd.f32 %v3369_v53, %v2337_v13  ;;  %v1611_v12 = vpop.f32.mrb[7].mxu1 }
 0x6b2   :  { %v1627_v54 = vadd.f32 %v2337_v13, %v1611_v12 }
 0x6b3   :  { %1630 = vst [vmem:[%s5141_s3 + $0x8] sm:$0xff] %v1628_v23 }
 0x6b4   :  { %1629 = vst [vmem:[%s5141_s3] sm:$0xff] %v1627_v54 }
 0x6d0   :  { %v3509_v30 = vpop.f32.mrb[8].mxu1 }
 0x6d1   :  { %v2026_v44 = vmax.f32 %v1933_v60, %v3509_v30  ;;  %v2016_v36 = vpop.f32.mrb[9].mxu1 }
 0x6d2   :  { %v2025_v6 = vmax.f32 %v4980_v52, %v2016_v36 }
 0x6d3   :  { %v2033_v17 = vmul.f32 %v4987_v58, %v2026_v44 }
 0x6d4   :  { %v2032_v37 = vmul.f32 %v4987_v58, %v2025_v6 }
 0x6d5   :  { %2035 = vst [vmem:[#allocation2 + $0x21] sm:$0x7f] %v2033_v17 }
 0x6d6   :  { %2034 = vst [vmem:[#allocation2 + $0x19] sm:$0xff] %v2032_v37  ;;  %3542 = vmatprep.mubr.f32.mxu1 %v2032_v37 }
 0x6dc   :  { %v2056_v63 = vld [vmem:[#allocation2 + $0x21] sm:$0xff] }
 0x6dd   :  { %3543 = vmatmul.mubr.f32.vlgmr.msra.gmra.mrb[10].mxu1 %v2056_v63  ;;  %v2037_v28 = vld [vmem:[#allocation2 + $0x18] sm:$0xff]  ;;  %v2038_v59 = vld [vmem:[#allocation2 + $0x20] sm:$0xff] }
 0x6de   :  { %4322 = vmatpush3.bf16.msra.mxu1 %v4974_v45  ;;  %3577 = vmatprep.mubr.f32.mxu1 %v2037_v28  ;;  %v2223_v16 = vld [vmem:[#allocation2 + $0x1a] sm:$0xff]  ;;  %v2224_v24 = vld [vmem:[#allocation2 + $0x22] sm:$0xff] }
 0x6df   :  { %4324 = vmatprep.subr.bf16.mxu1 %v4991_v35 }
 0x6e2   :  { %4326 = vmatpush3.bf16.msra.mxu1 %v4991_v35 }
 0x6e3   :  { %4328 = vmatprep.subr.bf16.mxu1 %v4995_v42 }
 0x6e6   :  { %4330 = vmatpush3.bf16.msra.mxu1 %v4995_v42 }
 0x6e7   :  { %4332 = vmatprep.subr.bf16.mxu1 %v4999_v55 }
 0x6ea   :  { %4334 = vmatpush3.bf16.msra.mxu1 %v4999_v55 }
 0x6eb   :  { %4336 = vmatprep.subr.bf16.mxu1 %v5003_v2 }
 0x6ee   :  { %4338 = vmatpush3.bf16.msra.mxu1 %v5003_v2 }
 0x6ef   :  { %4340 = vmatprep.subr.bf16.mxu1 %v5007_v11 }
 0x6f2   :  { %4342 = vmatpush3.bf16.msra.mxu1 %v5007_v11 }
 0x6f3   :  { %4344 = vmatprep.subr.bf16.mxu1 %v5011_v14 }
 0x6f6   :  { %4346 = vmatpush3.bf16.msra.mxu1 %v5011_v14 }
 0x6f7   :  { %4348 = vmatprep.subr.bf16.mxu1 %v5015_v43 }
 0x6fa   :  { %4350 = vmatpush3.bf16.msra.mxu1 %v5015_v43 }
 0x6fb   :  { %4352 = vmatprep.subr.bf16.mxu1 %v5019_v26 }
 0x6fd   :  { %3578 = vmatmul.mubr.f32.vlgmr.msra.gmra.mrb[10].mxu1 %v2038_v59 }
 0x6fe   :  { %4354 = vmatpush3.bf16.msra.mxu1 %v5019_v26  ;;  %3612 = vmatprep.mubr.f32.mxu1 %v2223_v16 }
 0x6ff   :  { %4356 = vmatprep.subr.bf16.mxu1 %v5023_v49 }
 0x702   :  { %4358 = vmatpush3.bf16.msra.mxu1 %v5023_v49 }
 0x703   :  { %4360 = vmatprep.subr.bf16.mxu1 %v5027_v5 }
 0x706   :  { %4362 = vmatpush3.bf16.msra.mxu1 %v5027_v5 }
 0x707   :  { %4364 = vmatprep.subr.bf16.mxu1 %v5031_v47 }
 0x70a   :  { %4366 = vmatpush3.bf16.msra.mxu1 %v5031_v47 }
 0x70b   :  { %4368 = vmatprep.subr.bf16.mxu1 %v5035_v62 }
 0x70e   :  { %4370 = vmatpush3.bf16.msra.mxu1 %v5035_v62 }
 0x70f   :  { %4372 = vmatprep.subr.bf16.mxu1 %v5039_v18 }
 0x712   :  { %4374 = vmatpush3.bf16.msra.mxu1 %v5039_v18 }
 0x713   :  { %4376 = vmatprep.subr.bf16.mxu1 %v5043_v39 }
 0x716   :  { %4378 = vmatpush3.bf16.msra.mxu1 %v5043_v39 }
 0x717   :  { %4380 = vmatprep.subr.bf16.mxu1 %v5047_v8 }
 0x71a   :  { %4382 = vmatpush3.bf16.msra.mxu1 %v5047_v8 }
 0x71d   :  { %3613 = vmatmul.mubr.f32.vlgmr.msra.gmra.mrb[10].mxu1 %v2224_v24 }
 0x7f0   :  { %v3614_v38 = vpop.f32.mrb[10].mxu1 }
 0x7f1   :  { %v2324_v45 = vadd.f32 %v3614_v38, %v2337_v13  ;;  %v2307_v52 = vpop.f32.mrb[11].mxu1 }
 0x7f2   :  { %v2323_v58 = vadd.f32 %v2337_v13, %v2307_v52 }
 0x7f3   :  { %2342 = vst [vmem:[%s5141_s3 + $0x18] sm:$0xff] %v2324_v45 }
 0x7f4   :  { %2341 = vst [vmem:[%s5141_s3 + $0x10] sm:$0xff] %v2323_v58 }
 0x7f5   :  { %2332 = vsyncpa [#allocation4], 1 }

</bundles_post_ra>
